<compile_context>
chip_gen: v6e
topology: v6e:2x2x1
jax: 0.10.0
libtpu: 0.0.40
codegen_flags: <defaults>
</compile_context>

<pallas_src>
import math
import functools

import jax
import jax.numpy as jnp
from jax import lax
from jax.experimental import pallas as pl
from jax.experimental.pallas import tpu as pltpu

PHI = (1.0 + 5.0 ** 0.5) / 2.0
THRESHOLD_FACTOR = 1.25
NEG_INF = -1e30          # exp underflows to exactly 0, same effect as -inf mask
_LANE = 128


# ----------------------------------------------------------------------------
# Fused forward kernel: embedding -> L x QuantumAttentionBlock -> output proj
# ----------------------------------------------------------------------------
def _fused_model_kernel(x_ref, embw_ref, embb_ref,
                        wqkvt_ref, wo_ref, aux_ref,
                        outw_ref, outb_ref, o_ref, *, B, S, H, L):
    # Hoisted compile-time constants (causal mask built once, reused by all
    # layers / batch elements).
    row = lax.broadcasted_iota(jnp.int32, (S, S), 0)
    col = lax.broadcasted_iota(jnp.int32, (S, S), 1)
    causal = row >= col
    inv_sqrt_h = jnp.float32(1.0 / math.sqrt(H))
    n = S * S

    # Embedding on the whole flattened batch: (B*S, F) @ (F, H) + (1, H)
    h = jnp.dot(x_ref[...], embw_ref[...],
                preferred_element_type=jnp.float32) + embb_ref[...]

    for l in range(L):                       # static unroll (L = 3)
        # Fused [Wq | Wk | Wv | Wto_quantum | 0] projection, bias in last row.
        wqkvt = wqkvt_ref[l]                 # (H+1, 128)
        y = jnp.dot(h, wqkvt[:H, :],
                    preferred_element_type=jnp.float32) + wqkvt[H:H + 1, :]
        q = y[:, 0:H]                        # (B*S, H)
        k = y[:, H:2 * H]
        v = y[:, 2 * H:3 * H]
        qx = y[:, 3 * H:3 * H + 1]           # (B*S, 1)
        qy = y[:, 3 * H + 1:3 * H + 2]

        # Per-batch phase-aware binary attention (short static loop, B = 2).
        ctx_parts = []
        for b in range(B):
            lo, hi = b * S, (b + 1) * S
            qb, kb, vb = q[lo:hi, :], k[lo:hi, :], v[lo:hi, :]
            qxb, qyb = qx[lo:hi, :], qy[lo:hi, :]

            # q @ k^T via dot_general (transposed operand fed to MXU natively)
            scores = lax.dot_general(
                qb, kb, (((1,), (1,)), ((), ())),
                preferred_element_type=jnp.float32) * inv_sqrt_h   # (S, S)

            dx = qxb - qxb.T                 # diff[i, j] = r[i] - r[j]
            dy = qyb - qyb.T
            dist_sq = dx * dx + dy * dy      # (S, S)

            # forward_bias = 0.5*(1 + cos(atan2(dy, dx))); cos(atan2) = dx/hypot,
            # and atan2(0,0) = 0 -> cos = 1 on the diagonal.
            safe = jnp.where(dist_sq > 0.0, dist_sq, 1.0)
            cos_pd = jnp.where(dist_sq > 0.0, dx * lax.rsqrt(safe), 1.0)
            forward_bias = 0.5 * (1.0 + cos_pd)

            mean_d = jnp.sum(dist_sq) / n
            var_d = jnp.sum((dist_sq - mean_d) ** 2) / (n - 1)   # torch.std: unbiased
            threshold = mean_d + THRESHOLD_FACTOR * jnp.sqrt(var_d)

            valid = (dist_sq <= threshold) & causal
            binary_attn = jnp.where(valid, forward_bias, 0.0)
            masked = jnp.where(binary_attn == 0.0, jnp.float32(NEG_INF), scores)

            m = jnp.max(masked, axis=-1, keepdims=True)
            e = jnp.exp(masked - m)
            denom = jnp.sum(e, axis=-1, keepdims=True)
            weights = e * pl.reciprocal(denom, approx=True)      # EUP reciprocal
            ctx_parts.append(jnp.dot(weights, vb,
                                     preferred_element_type=jnp.float32))

        context = jnp.concatenate(ctx_parts, axis=0)             # (B*S, H)

        # Output projection (bias packed in last row).
        wo = wo_ref[l]                                           # (H+1, H)
        output = jnp.dot(context, wo[:H, :],
                         preferred_element_type=jnp.float32) + wo[H:H + 1, :]

        # r_embed = F.normalize(qp); from_quantum is rank-1 expanded.
        aux = aux_ref[l]                                         # (3, H): wfq rows 0-1, bfq row 2
        inv_norm = lax.rsqrt(jnp.maximum(qx * qx + qy * qy, jnp.float32(1e-24)))
        rx = qx * inv_norm
        ry = qy * inv_norm
        quantum_out = rx * aux[0:1, :] + ry * aux[1:2, :] + aux[2:3, :]

        h = h + output + 0.1 * quantum_out

    # Final output projection; lane-dense padded (B*S, 128) store.
    o_ref[...] = jnp.dot(h, outw_ref[...],
                         preferred_element_type=jnp.float32) + outb_ref[...]


# ----------------------------------------------------------------------------
# Wrapper: pack params into a few lane-dense slabs, single pallas_call
# ----------------------------------------------------------------------------
def model_forward(x, params):
    emb_w, emb_b, layer_params, out_w, out_b = params
    B, S, Fdim = x.shape
    H = emb_w.shape[1]
    OUT = out_w.shape[1]
    L = len(layer_params)

    padw = ((3 * H + 2 + _LANE - 1) // _LANE) * _LANE
    out_pad = ((OUT + _LANE - 1) // _LANE) * _LANE

    wqkvt_list, wo_list, aux_list = [], [], []
    for (wq, bq, wk, bk, wv, bv, wo, bo, wtq, btq, wfq, bfq) in layer_params:
        wf = jnp.zeros((H, padw), jnp.float32)
        wf = wf.at[:, 0:H].set(wq)
        wf = wf.at[:, H:2 * H].set(wk)
        wf = wf.at[:, 2 * H:3 * H].set(wv)
        wf = wf.at[:, 3 * H:3 * H + 2].set(wtq)
        bf = jnp.zeros((padw,), jnp.float32)
        bf = bf.at[0:H].set(bq).at[H:2 * H].set(bk)
        bf = bf.at[2 * H:3 * H].set(bv).at[3 * H:3 * H + 2].set(btq)
        wqkvt_list.append(jnp.concatenate([wf, bf[None, :]], axis=0))   # (H+1, padw)
        wo_list.append(jnp.concatenate([wo, bo[None, :]], axis=0))      # (H+1, H)
        aux_list.append(jnp.concatenate([wfq, bfq[None, :]], axis=0))   # (3, H)

    wqkvt_s = jnp.stack(wqkvt_list)   # (L, H+1, padw)
    wo_s = jnp.stack(wo_list)         # (L, H+1, H)
    aux_s = jnp.stack(aux_list)       # (L, 3, H)

    outw_p = jnp.zeros((H, out_pad), jnp.float32).at[:, :OUT].set(out_w)
    outb_p = jnp.zeros((1, out_pad), jnp.float32).at[:, :OUT].set(out_b)

    x2d = x.reshape(B * S, Fdim)
    emb_b2 = emb_b.reshape(1, H)

    kernel = functools.partial(_fused_model_kernel, B=B, S=S, H=H, L=L)

    def full(shape):
        nd = len(shape)
        return pl.BlockSpec(shape, lambda i, nd=nd: (0,) * nd)

    args = (x2d, emb_w, emb_b2, wqkvt_s, wo_s, aux_s, outw_p, outb_p)
    y2d = pl.pallas_call(
        kernel,
        out_shape=jax.ShapeDtypeStruct((B * S, out_pad), jnp.float32),
        grid=(1,),
        in_specs=[full(a.shape) for a in args],
        out_specs=full((B * S, out_pad)),
        compiler_params=pltpu.CompilerParams(dimension_semantics=("arbitrary",)),
    )(*args)

    return y2d[:, :OUT].reshape(B, S, OUT)


# ----------------------------------------------------------------------------
# Side statistic (coherence_history): plain-JAX glue, not part of the output
# ----------------------------------------------------------------------------
def coherence_stat(x):
    # TODO(synk): torch appends this via .item() to a Python list; stateful
    # history logging has no Pallas equivalent, only the value is computed.
    B, S, Fdim = x.shape
    xf = x.reshape(-1, Fdim)
    mn = jnp.min(xf, axis=1, keepdims=True)
    mx = jnp.max(xf, axis=1, keepdims=True)
    normalized = (xf - mn) / (mx - mn + 1e-8)
    phase = 2.0 * math.pi * normalized * PHI
    ph = jnp.arctan2(jnp.sin(phase), jnp.cos(phase)).reshape(B, S, Fdim)
    sin_mean = jnp.mean(jnp.sin(ph), axis=(1, 2))
    cos_mean = jnp.mean(jnp.cos(ph), axis=(1, 2))
    return jnp.mean(jnp.sqrt(sin_mean ** 2 + cos_mean ** 2))


# ----------------------------------------------------------------------------
# Pure-JAX reference of the torch forward (for numerical validation)
# ----------------------------------------------------------------------------
def model_forward_ref(x, params):
    emb_w, emb_b, layer_params, out_w, out_b = params
    B, S, _ = x.shape
    H = emb_w.shape[1]
    h = x @ emb_w + emb_b
    causal = jnp.tril(jnp.ones((S, S), bool))
    for (wq, bq, wk, bk, wv, bv, wo, bo, wtq, btq, wfq, bfq) in layer_params:
        q = h @ wq + bq
        k = h @ wk + bk
        v = h @ wv + bv
        scores = jnp.einsum('bid,bjd->bij', q, k) / math.sqrt(H)
        qp = h @ wtq + btq                                   # (B, S, 2)
        diff = qp[:, :, None, :] - qp[:, None, :, :]
        dist_sq = jnp.sum(diff ** 2, axis=-1)
        forward_bias = 0.5 * (1.0 + jnp.cos(jnp.arctan2(diff[..., 1], diff[..., 0])))
        mean_d = jnp.mean(dist_sq, axis=(1, 2), keepdims=True)
        std_d = jnp.std(dist_sq, axis=(1, 2), keepdims=True, ddof=1)
        threshold = mean_d + THRESHOLD_FACTOR * std_d
        valid = (dist_sq <= threshold) & causal[None]
        binary_attn = jnp.where(valid, forward_bias, 0.0)
        masked = jnp.where(binary_attn == 0.0, -jnp.inf, scores)
        weights = jax.nn.softmax(masked, axis=-1)
        context = jnp.einsum('bij,bjd->bid', weights, v)
        output = context @ wo + bo
        norm = jnp.maximum(jnp.linalg.norm(qp, axis=-1, keepdims=True), 1e-12)
        r = qp / norm
        h = h + output + 0.1 * (r @ wfq + bfq)
    return h @ out_w + out_b


# ----------------------------------------------------------------------------
# Deterministic parameter init (shapes from the module __init__)
# ----------------------------------------------------------------------------
def init_params(key, input_dim, hidden_dim, output_dim, num_layers=3):
    def nrm(k, shape, scale=0.02):
        return scale * jax.random.normal(k, shape, jnp.float32)

    keys = jax.random.split(key, 2 + num_layers)
    emb_w = nrm(keys[0], (input_dim, hidden_dim), 0.1)
    emb_b = jnp.zeros((hidden_dim,), jnp.float32)
    out_w = nrm(keys[1], (hidden_dim, output_dim), 0.1)
    out_b = jnp.zeros((output_dim,), jnp.float32)

    layer_params = []
    for l in range(num_layers):
        lk = jax.random.split(keys[2 + l], 6)
        H = hidden_dim
        wq = nrm(lk[0], (H, H)); bq = jnp.zeros((H,), jnp.float32)
        wk = nrm(lk[1], (H, H)); bk = jnp.zeros((H,), jnp.float32)
        wv = nrm(lk[2], (H, H)); bv = jnp.zeros((H,), jnp.float32)
        wo = nrm(lk[3], (H, H)); bo = jnp.zeros((H,), jnp.float32)
        wtq = nrm(lk[4], (H, 2), 0.1); btq = jnp.zeros((2,), jnp.float32)  # to_quantum
        wfq = nrm(lk[5], (2, H));      bfq = jnp.zeros((H,), jnp.float32)  # from_quantum
        layer_params.append((wq, bq, wk, bk, wv, bv, wo, bo, wtq, btq, wfq, bfq))

    return emb_w, emb_b, layer_params, out_w, out_b


if __name__ == "__main__":
    B, S, F_IN, HID, OUT = 2, 8, 4, 32, 4
    NUM_LAYERS = 3

    root = jax.random.PRNGKey(0)
    kx, kp = jax.random.split(root)
    x = jax.random.normal(kx, (B, S, F_IN), jnp.float32)
    params = init_params(kp, F_IN, HID, OUT, NUM_LAYERS)

    fwd = jax.jit(model_forward)
    y = fwd(x, params)
    coh = coherence_stat(x)            # side statistic (coherence_history)
    jax.block_until_ready(y)
    jax.block_until_ready(coh)

    assert y.shape == (B, S, OUT)
    assert bool(jnp.all(jnp.isfinite(y)))

    # Numerical check against the pure-JAX reference of the torch forward.
    y_ref = model_forward_ref(x, params)
    assert float(jnp.max(jnp.abs(y - y_ref))) < 2e-2

    print("KERNEL_OK")
</pallas_src>

<mosaic_0001>
module attributes {stable_mosaic.version = 11 : i64} {
  func.func @_fused_model_kernel(%arg0: i32, %arg1: memref<16x4xf32, #tpu.memory_space<vmem>>, %arg2: memref<4x32xf32, #tpu.memory_space<vmem>>, %arg3: memref<1x32xf32, #tpu.memory_space<vmem>>, %arg4: memref<3x33x128xf32, #tpu.memory_space<vmem>>, %arg5: memref<3x33x32xf32, #tpu.memory_space<vmem>>, %arg6: memref<3x3x32xf32, #tpu.memory_space<vmem>>, %arg7: memref<32x128xf32, #tpu.memory_space<vmem>>, %arg8: memref<1x128xf32, #tpu.memory_space<vmem>>, %arg9: memref<16x128xf32, #tpu.memory_space<vmem>>) attributes {dimension_semantics = [#tpu.dimension_semantics<arbitrary>], iteration_bounds = array<i64: 1>, scalar_prefetch = 0 : i64, scratch_operands = 0 : i64, tpu.core_type = #tpu.core_type<tc>, window_params = [{pipeline_mode = #tpu.pipeline_mode<synchronous>, transform_indices = @transform_0, window_bounds = array<i64: 16, 4>}, {pipeline_mode = #tpu.pipeline_mode<synchronous>, transform_indices = @transform_1, window_bounds = array<i64: 4, 32>}, {pipeline_mode = #tpu.pipeline_mode<synchronous>, transform_indices = @transform_2, window_bounds = array<i64: 1, 32>}, {pipeline_mode = #tpu.pipeline_mode<synchronous>, transform_indices = @transform_3, window_bounds = array<i64: 3, 33, 128>}, {pipeline_mode = #tpu.pipeline_mode<synchronous>, transform_indices = @transform_4, window_bounds = array<i64: 3, 33, 32>}, {pipeline_mode = #tpu.pipeline_mode<synchronous>, transform_indices = @transform_5, window_bounds = array<i64: 3, 3, 32>}, {pipeline_mode = #tpu.pipeline_mode<synchronous>, transform_indices = @transform_6, window_bounds = array<i64: 32, 128>}, {pipeline_mode = #tpu.pipeline_mode<synchronous>, transform_indices = @transform_7, window_bounds = array<i64: 1, 128>}, {pipeline_mode = #tpu.pipeline_mode<synchronous>, transform_indices = @transform_8, window_bounds = array<i64: 16, 128>}]} {
    %0 = tpu.iota {dimensions = array<i32: 0>} : vector<8x8xi32>
    %1 = tpu.iota {dimensions = array<i32: 1>} : vector<8x8xi32>
    %2 = arith.cmpi sge, %0, %1 : vector<8x8xi32>
    %c0 = arith.constant 0 : index
    %c0_0 = arith.constant 0 : index
    %3 = vector.load %arg1[%c0, %c0_0] : memref<16x4xf32, #tpu.memory_space<vmem>>, vector<16x4xf32>
    %c0_1 = arith.constant 0 : index
    %c0_2 = arith.constant 0 : index
    %4 = vector.load %arg2[%c0_1, %c0_2] : memref<4x32xf32, #tpu.memory_space<vmem>>, vector<4x32xf32>
    %cst = arith.constant dense<0.000000e+00> : vector<16x32xf32>
    %5 = tpu.matmul %3, %4, %cst {dimension_numbers = #tpu.dot_dimension_numbers<[1], [0], [0], [1], [0, 0, 1, 1], [], []>} : vector<16x4xf32>, vector<4x32xf32>, vector<16x32xf32> -> vector<16x32xf32>
    %c0_3 = arith.constant 0 : index
    %c0_4 = arith.constant 0 : index
    %6 = vector.load %arg3[%c0_3, %c0_4] : memref<1x32xf32, #tpu.memory_space<vmem>>, vector<1x32xf32>
    %7 = vector.broadcast %6 : vector<1x32xf32> to vector<16x32xf32>
    %8 = arith.addf %5, %7 : vector<16x32xf32>
    %c0_5 = arith.constant 0 : index
    %c0_6 = arith.constant 0 : index
    %c0_7 = arith.constant 0 : index
    %9 = vector.load %arg4[%c0_5, %c0_6, %c0_7] : memref<3x33x128xf32, #tpu.memory_space<vmem>>, vector<1x33x128xf32>
    %10 = vector.shape_cast %9 : vector<1x33x128xf32> to vector<33x128xf32>
    %11 = vector.extract_strided_slice %10 {offsets = [0, 0], sizes = [32, 128], strides = [1, 1]} : vector<33x128xf32> to vector<32x128xf32>
    %cst_8 = arith.constant dense<0.000000e+00> : vector<16x128xf32>
    %12 = tpu.matmul %8, %11, %cst_8 {dimension_numbers = #tpu.dot_dimension_numbers<[1], [0], [0], [1], [0, 0, 1, 1], [], []>} : vector<16x32xf32>, vector<32x128xf32>, vector<16x128xf32> -> vector<16x128xf32>
    %13 = vector.extract_strided_slice %10 {offsets = [32, 0], sizes = [1, 128], strides = [1, 1]} : vector<33x128xf32> to vector<1x128xf32>
    %14 = vector.broadcast %13 : vector<1x128xf32> to vector<16x128xf32>
    %15 = arith.addf %12, %14 : vector<16x128xf32>
    %16 = vector.extract_strided_slice %15 {offsets = [0, 0], sizes = [16, 32], strides = [1, 1]} : vector<16x128xf32> to vector<16x32xf32>
    %17 = vector.extract_strided_slice %15 {offsets = [0, 32], sizes = [16, 32], strides = [1, 1]} : vector<16x128xf32> to vector<16x32xf32>
    %18 = vector.extract_strided_slice %15 {offsets = [0, 64], sizes = [16, 32], strides = [1, 1]} : vector<16x128xf32> to vector<16x32xf32>
    %19 = vector.extract_strided_slice %15 {offsets = [0, 96], sizes = [16, 1], strides = [1, 1]} : vector<16x128xf32> to vector<16x1xf32>
    %20 = vector.extract_strided_slice %15 {offsets = [0, 97], sizes = [16, 1], strides = [1, 1]} : vector<16x128xf32> to vector<16x1xf32>
    %21 = vector.extract_strided_slice %16 {offsets = [0, 0], sizes = [8, 32], strides = [1, 1]} : vector<16x32xf32> to vector<8x32xf32>
    %22 = vector.extract_strided_slice %17 {offsets = [0, 0], sizes = [8, 32], strides = [1, 1]} : vector<16x32xf32> to vector<8x32xf32>
    %23 = vector.extract_strided_slice %18 {offsets = [0, 0], sizes = [8, 32], strides = [1, 1]} : vector<16x32xf32> to vector<8x32xf32>
    %24 = vector.extract_strided_slice %19 {offsets = [0, 0], sizes = [8, 1], strides = [1, 1]} : vector<16x1xf32> to vector<8x1xf32>
    %25 = vector.extract_strided_slice %20 {offsets = [0, 0], sizes = [8, 1], strides = [1, 1]} : vector<16x1xf32> to vector<8x1xf32>
    %cst_9 = arith.constant dense<0.000000e+00> : vector<8x8xf32>
    %26 = tpu.matmul %21, %22, %cst_9 {dimension_numbers = #tpu.dot_dimension_numbers<[1], [1], [0], [0], [0, 0, 1, 0], [], []>} : vector<8x32xf32>, vector<8x32xf32>, vector<8x8xf32> -> vector<8x8xf32>
    %cst_10 = arith.constant 0.176776692 : f32
    %27 = vector.broadcast %cst_10 : f32 to vector<8x8xf32>
    %28 = arith.mulf %26, %27 : vector<8x8xf32>
    %29 = tpu.transpose %24, [1, 0] : vector<8x1xf32> -> vector<1x8xf32>
    %30 = vector.broadcast %24 : vector<8x1xf32> to vector<8x8xf32>
    %31 = vector.broadcast %29 : vector<1x8xf32> to vector<8x8xf32>
    %32 = arith.subf %30, %31 : vector<8x8xf32>
    %33 = tpu.transpose %25, [1, 0] : vector<8x1xf32> -> vector<1x8xf32>
    %34 = vector.broadcast %25 : vector<8x1xf32> to vector<8x8xf32>
    %35 = vector.broadcast %33 : vector<1x8xf32> to vector<8x8xf32>
    %36 = arith.subf %34, %35 : vector<8x8xf32>
    %37 = arith.mulf %32, %32 : vector<8x8xf32>
    %38 = arith.mulf %36, %36 : vector<8x8xf32>
    %39 = arith.addf %37, %38 : vector<8x8xf32>
    %cst_11 = arith.constant 0.000000e+00 : f32
    %40 = vector.broadcast %cst_11 : f32 to vector<8x8xf32>
    %41 = arith.cmpf ogt, %39, %40 : vector<8x8xf32>
    %cst_12 = arith.constant 1.000000e+00 : f32
    %42 = vector.broadcast %cst_12 : f32 to vector<8x8xf32>
    %43 = arith.select %41, %39, %42 : vector<8x8xi1>, vector<8x8xf32>
    %cst_13 = arith.constant 0.000000e+00 : f32
    %44 = vector.broadcast %cst_13 : f32 to vector<8x8xf32>
    %45 = arith.cmpf ogt, %39, %44 : vector<8x8xf32>
    %46 = math.rsqrt %43 : vector<8x8xf32>
    %47 = arith.mulf %32, %46 : vector<8x8xf32>
    %cst_14 = arith.constant 1.000000e+00 : f32
    %48 = vector.broadcast %cst_14 : f32 to vector<8x8xf32>
    %49 = arith.select %45, %47, %48 : vector<8x8xi1>, vector<8x8xf32>
    %cst_15 = arith.constant 1.000000e+00 : f32
    %50 = vector.broadcast %cst_15 : f32 to vector<8x8xf32>
    %51 = arith.addf %50, %49 : vector<8x8xf32>
    %cst_16 = arith.constant 5.000000e-01 : f32
    %52 = vector.broadcast %cst_16 : f32 to vector<8x8xf32>
    %53 = arith.mulf %52, %51 : vector<8x8xf32>
    %54 = vector.shape_cast %39 : vector<8x8xf32> to vector<1x8x8xf32>
    %cst_17 = arith.constant dense<0.000000e+00> : vector<1xf32>
    %55 = vector.multi_reduction <add>, %54, %cst_17 [1, 2] : vector<1x8x8xf32> to vector<1xf32>
    %56 = vector.shape_cast %55 : vector<1xf32> to vector<1x1x1xf32>
    %57 = vector.extract %56[0, 0, 0] : f32 from vector<1x1x1xf32>
    %cst_18 = arith.constant 6.400000e+01 : f32
    %58 = arith.divf %57, %cst_18 : f32
    %59 = vector.broadcast %58 : f32 to vector<8x8xf32>
    %60 = arith.subf %39, %59 : vector<8x8xf32>
    %61 = arith.mulf %60, %60 : vector<8x8xf32>
    %62 = vector.shape_cast %61 : vector<8x8xf32> to vector<1x8x8xf32>
    %cst_19 = arith.constant dense<0.000000e+00> : vector<1xf32>
    %63 = vector.multi_reduction <add>, %62, %cst_19 [1, 2] : vector<1x8x8xf32> to vector<1xf32>
    %64 = vector.shape_cast %63 : vector<1xf32> to vector<1x1x1xf32>
    %65 = vector.extract %64[0, 0, 0] : f32 from vector<1x1x1xf32>
    %cst_20 = arith.constant 6.300000e+01 : f32
    %66 = arith.divf %65, %cst_20 : f32
    %67 = math.sqrt %66 : f32
    %cst_21 = arith.constant 1.250000e+00 : f32
    %68 = arith.mulf %cst_21, %67 : f32
    %69 = arith.addf %58, %68 : f32
    %70 = vector.broadcast %69 : f32 to vector<8x8xf32>
    %71 = arith.cmpf ole, %39, %70 : vector<8x8xf32>
    %72 = arith.andi %71, %2 : vector<8x8xi1>
    %cst_22 = arith.constant 0.000000e+00 : f32
    %73 = vector.broadcast %cst_22 : f32 to vector<8x8xf32>
    %74 = arith.select %72, %53, %73 : vector<8x8xi1>, vector<8x8xf32>
    %cst_23 = arith.constant 0.000000e+00 : f32
    %75 = vector.broadcast %cst_23 : f32 to vector<8x8xf32>
    %76 = arith.cmpf oeq, %74, %75 : vector<8x8xf32>
    %cst_24 = arith.constant -1.000000e+30 : f32
    %77 = vector.broadcast %cst_24 : f32 to vector<8x8xf32>
    %78 = arith.select %76, %77, %28 : vector<8x8xi1>, vector<8x8xf32>
    %cst_25 = arith.constant dense<0xFF800000> : vector<8xf32>
    %79 = vector.multi_reduction <maximumf>, %78, %cst_25 [1] : vector<8x8xf32> to vector<8xf32>
    %80 = vector.shape_cast %79 : vector<8xf32> to vector<8x1xf32>
    %81 = vector.broadcast %80 : vector<8x1xf32> to vector<8x8xf32>
    %82 = arith.subf %78, %81 : vector<8x8xf32>
    %83 = math.exp %82 : vector<8x8xf32>
    %cst_26 = arith.constant dense<0.000000e+00> : vector<8xf32>
    %84 = vector.multi_reduction <add>, %83, %cst_26 [1] : vector<8x8xf32> to vector<8xf32>
    %85 = vector.shape_cast %84 : vector<8xf32> to vector<8x1xf32>
    %86 = tpu.reciprocal %85 {approx = true} : vector<8x1xf32> -> vector<8x1xf32>
    %87 = vector.broadcast %86 : vector<8x1xf32> to vector<8x8xf32>
    %88 = arith.mulf %83, %87 : vector<8x8xf32>
    %cst_27 = arith.constant dense<0.000000e+00> : vector<8x32xf32>
    %89 = tpu.matmul %88, %23, %cst_27 {dimension_numbers = #tpu.dot_dimension_numbers<[1], [0], [0], [1], [0, 0, 1, 1], [], []>} : vector<8x8xf32>, vector<8x32xf32>, vector<8x32xf32> -> vector<8x32xf32>
    %90 = vector.extract_strided_slice %16 {offsets = [8, 0], sizes = [8, 32], strides = [1, 1]} : vector<16x32xf32> to vector<8x32xf32>
    %91 = vector.extract_strided_slice %17 {offsets = [8, 0], sizes = [8, 32], strides = [1, 1]} : vector<16x32xf32> to vector<8x32xf32>
    %92 = vector.extract_strided_slice %18 {offsets = [8, 0], sizes = [8, 32], strides = [1, 1]} : vector<16x32xf32> to vector<8x32xf32>
    %93 = vector.extract_strided_slice %19 {offsets = [8, 0], sizes = [8, 1], strides = [1, 1]} : vector<16x1xf32> to vector<8x1xf32>
    %94 = vector.extract_strided_slice %20 {offsets = [8, 0], sizes = [8, 1], strides = [1, 1]} : vector<16x1xf32> to vector<8x1xf32>
    %cst_28 = arith.constant dense<0.000000e+00> : vector<8x8xf32>
    %95 = tpu.matmul %90, %91, %cst_28 {dimension_numbers = #tpu.dot_dimension_numbers<[1], [1], [0], [0], [0, 0, 1, 0], [], []>} : vector<8x32xf32>, vector<8x32xf32>, vector<8x8xf32> -> vector<8x8xf32>
    %cst_29 = arith.constant 0.176776692 : f32
    %96 = vector.broadcast %cst_29 : f32 to vector<8x8xf32>
    %97 = arith.mulf %95, %96 : vector<8x8xf32>
    %98 = tpu.transpose %93, [1, 0] : vector<8x1xf32> -> vector<1x8xf32>
    %99 = vector.broadcast %93 : vector<8x1xf32> to vector<8x8xf32>
    %100 = vector.broadcast %98 : vector<1x8xf32> to vector<8x8xf32>
    %101 = arith.subf %99, %100 : vector<8x8xf32>
    %102 = tpu.transpose %94, [1, 0] : vector<8x1xf32> -> vector<1x8xf32>
    %103 = vector.broadcast %94 : vector<8x1xf32> to vector<8x8xf32>
    %104 = vector.broadcast %102 : vector<1x8xf32> to vector<8x8xf32>
    %105 = arith.subf %103, %104 : vector<8x8xf32>
    %106 = arith.mulf %101, %101 : vector<8x8xf32>
    %107 = arith.mulf %105, %105 : vector<8x8xf32>
    %108 = arith.addf %106, %107 : vector<8x8xf32>
    %cst_30 = arith.constant 0.000000e+00 : f32
    %109 = vector.broadcast %cst_30 : f32 to vector<8x8xf32>
    %110 = arith.cmpf ogt, %108, %109 : vector<8x8xf32>
    %cst_31 = arith.constant 1.000000e+00 : f32
    %111 = vector.broadcast %cst_31 : f32 to vector<8x8xf32>
    %112 = arith.select %110, %108, %111 : vector<8x8xi1>, vector<8x8xf32>
    %cst_32 = arith.constant 0.000000e+00 : f32
    %113 = vector.broadcast %cst_32 : f32 to vector<8x8xf32>
    %114 = arith.cmpf ogt, %108, %113 : vector<8x8xf32>
    %115 = math.rsqrt %112 : vector<8x8xf32>
    %116 = arith.mulf %101, %115 : vector<8x8xf32>
    %cst_33 = arith.constant 1.000000e+00 : f32
    %117 = vector.broadcast %cst_33 : f32 to vector<8x8xf32>
    %118 = arith.select %114, %116, %117 : vector<8x8xi1>, vector<8x8xf32>
    %cst_34 = arith.constant 1.000000e+00 : f32
    %119 = vector.broadcast %cst_34 : f32 to vector<8x8xf32>
    %120 = arith.addf %119, %118 : vector<8x8xf32>
    %cst_35 = arith.constant 5.000000e-01 : f32
    %121 = vector.broadcast %cst_35 : f32 to vector<8x8xf32>
    %122 = arith.mulf %121, %120 : vector<8x8xf32>
    %123 = vector.shape_cast %108 : vector<8x8xf32> to vector<1x8x8xf32>
    %cst_36 = arith.constant dense<0.000000e+00> : vector<1xf32>
    %124 = vector.multi_reduction <add>, %123, %cst_36 [1, 2] : vector<1x8x8xf32> to vector<1xf32>
    %125 = vector.shape_cast %124 : vector<1xf32> to vector<1x1x1xf32>
    %126 = vector.extract %125[0, 0, 0] : f32 from vector<1x1x1xf32>
    %cst_37 = arith.constant 6.400000e+01 : f32
    %127 = arith.divf %126, %cst_37 : f32
    %128 = vector.broadcast %127 : f32 to vector<8x8xf32>
    %129 = arith.subf %108, %128 : vector<8x8xf32>
    %130 = arith.mulf %129, %129 : vector<8x8xf32>
    %131 = vector.shape_cast %130 : vector<8x8xf32> to vector<1x8x8xf32>
    %cst_38 = arith.constant dense<0.000000e+00> : vector<1xf32>
    %132 = vector.multi_reduction <add>, %131, %cst_38 [1, 2] : vector<1x8x8xf32> to vector<1xf32>
    %133 = vector.shape_cast %132 : vector<1xf32> to vector<1x1x1xf32>
    %134 = vector.extract %133[0, 0, 0] : f32 from vector<1x1x1xf32>
    %cst_39 = arith.constant 6.300000e+01 : f32
    %135 = arith.divf %134, %cst_39 : f32
    %136 = math.sqrt %135 : f32
    %cst_40 = arith.constant 1.250000e+00 : f32
    %137 = arith.mulf %cst_40, %136 : f32
    %138 = arith.addf %127, %137 : f32
    %139 = vector.broadcast %138 : f32 to vector<8x8xf32>
    %140 = arith.cmpf ole, %108, %139 : vector<8x8xf32>
    %141 = arith.andi %140, %2 : vector<8x8xi1>
    %cst_41 = arith.constant 0.000000e+00 : f32
    %142 = vector.broadcast %cst_41 : f32 to vector<8x8xf32>
    %143 = arith.select %141, %122, %142 : vector<8x8xi1>, vector<8x8xf32>
    %cst_42 = arith.constant 0.000000e+00 : f32
    %144 = vector.broadcast %cst_42 : f32 to vector<8x8xf32>
    %145 = arith.cmpf oeq, %143, %144 : vector<8x8xf32>
    %cst_43 = arith.constant -1.000000e+30 : f32
    %146 = vector.broadcast %cst_43 : f32 to vector<8x8xf32>
    %147 = arith.select %145, %146, %97 : vector<8x8xi1>, vector<8x8xf32>
    %cst_44 = arith.constant dense<0xFF800000> : vector<8xf32>
    %148 = vector.multi_reduction <maximumf>, %147, %cst_44 [1] : vector<8x8xf32> to vector<8xf32>
    %149 = vector.shape_cast %148 : vector<8xf32> to vector<8x1xf32>
    %150 = vector.broadcast %149 : vector<8x1xf32> to vector<8x8xf32>
    %151 = arith.subf %147, %150 : vector<8x8xf32>
    %152 = math.exp %151 : vector<8x8xf32>
    %cst_45 = arith.constant dense<0.000000e+00> : vector<8xf32>
    %153 = vector.multi_reduction <add>, %152, %cst_45 [1] : vector<8x8xf32> to vector<8xf32>
    %154 = vector.shape_cast %153 : vector<8xf32> to vector<8x1xf32>
    %155 = tpu.reciprocal %154 {approx = true} : vector<8x1xf32> -> vector<8x1xf32>
    %156 = vector.broadcast %155 : vector<8x1xf32> to vector<8x8xf32>
    %157 = arith.mulf %152, %156 : vector<8x8xf32>
    %cst_46 = arith.constant dense<0.000000e+00> : vector<8x32xf32>
    %158 = tpu.matmul %157, %92, %cst_46 {dimension_numbers = #tpu.dot_dimension_numbers<[1], [0], [0], [1], [0, 0, 1, 1], [], []>} : vector<8x8xf32>, vector<8x32xf32>, vector<8x32xf32> -> vector<8x32xf32>
    %159 = tpu.concatenate %89, %158 in 0 : vector<8x32xf32>, vector<8x32xf32> -> vector<16x32xf32>
    %c0_47 = arith.constant 0 : index
    %c0_48 = arith.constant 0 : index
    %c0_49 = arith.constant 0 : index
    %160 = vector.load %arg5[%c0_47, %c0_48, %c0_49] : memref<3x33x32xf32, #tpu.memory_space<vmem>>, vector<1x33x32xf32>
    %161 = vector.shape_cast %160 : vector<1x33x32xf32> to vector<33x32xf32>
    %162 = vector.extract_strided_slice %161 {offsets = [0, 0], sizes = [32, 32], strides = [1, 1]} : vector<33x32xf32> to vector<32x32xf32>
    %cst_50 = arith.constant dense<0.000000e+00> : vector<16x32xf32>
    %163 = tpu.matmul %159, %162, %cst_50 {dimension_numbers = #tpu.dot_dimension_numbers<[1], [0], [0], [1], [0, 0, 1, 1], [], []>} : vector<16x32xf32>, vector<32x32xf32>, vector<16x32xf32> -> vector<16x32xf32>
    %164 = vector.extract_strided_slice %161 {offsets = [32, 0], sizes = [1, 32], strides = [1, 1]} : vector<33x32xf32> to vector<1x32xf32>
    %165 = vector.broadcast %164 : vector<1x32xf32> to vector<16x32xf32>
    %166 = arith.addf %163, %165 : vector<16x32xf32>
    %c0_51 = arith.constant 0 : index
    %c0_52 = arith.constant 0 : index
    %c0_53 = arith.constant 0 : index
    %167 = vector.load %arg6[%c0_51, %c0_52, %c0_53] : memref<3x3x32xf32, #tpu.memory_space<vmem>>, vector<1x3x32xf32>
    %168 = vector.shape_cast %167 : vector<1x3x32xf32> to vector<3x32xf32>
    %169 = arith.mulf %19, %19 : vector<16x1xf32>
    %170 = arith.mulf %20, %20 : vector<16x1xf32>
    %171 = arith.addf %169, %170 : vector<16x1xf32>
    %cst_54 = arith.constant 1.000000e-24 : f32
    %172 = vector.broadcast %cst_54 : f32 to vector<16x1xf32>
    %173 = arith.maximumf %171, %172 : vector<16x1xf32>
    %174 = math.rsqrt %173 : vector<16x1xf32>
    %175 = arith.mulf %19, %174 : vector<16x1xf32>
    %176 = arith.mulf %20, %174 : vector<16x1xf32>
    %177 = vector.extract_strided_slice %168 {offsets = [0, 0], sizes = [1, 32], strides = [1, 1]} : vector<3x32xf32> to vector<1x32xf32>
    %178 = vector.broadcast %175 : vector<16x1xf32> to vector<16x32xf32>
    %179 = vector.broadcast %177 : vector<1x32xf32> to vector<16x32xf32>
    %180 = arith.mulf %178, %179 : vector<16x32xf32>
    %181 = vector.extract_strided_slice %168 {offsets = [1, 0], sizes = [1, 32], strides = [1, 1]} : vector<3x32xf32> to vector<1x32xf32>
    %182 = vector.broadcast %176 : vector<16x1xf32> to vector<16x32xf32>
    %183 = vector.broadcast %181 : vector<1x32xf32> to vector<16x32xf32>
    %184 = arith.mulf %182, %183 : vector<16x32xf32>
    %185 = arith.addf %180, %184 : vector<16x32xf32>
    %186 = vector.extract_strided_slice %168 {offsets = [2, 0], sizes = [1, 32], strides = [1, 1]} : vector<3x32xf32> to vector<1x32xf32>
    %187 = vector.broadcast %186 : vector<1x32xf32> to vector<16x32xf32>
    %188 = arith.addf %185, %187 : vector<16x32xf32>
    %189 = arith.addf %8, %166 : vector<16x32xf32>
    %cst_55 = arith.constant 1.000000e-01 : f32
    %190 = vector.broadcast %cst_55 : f32 to vector<16x32xf32>
    %191 = arith.mulf %190, %188 : vector<16x32xf32>
    %192 = arith.addf %189, %191 : vector<16x32xf32>
    %c1 = arith.constant 1 : index
    %c0_56 = arith.constant 0 : index
    %c0_57 = arith.constant 0 : index
    %193 = vector.load %arg4[%c1, %c0_56, %c0_57] : memref<3x33x128xf32, #tpu.memory_space<vmem>>, vector<1x33x128xf32>
    %194 = vector.shape_cast %193 : vector<1x33x128xf32> to vector<33x128xf32>
    %195 = vector.extract_strided_slice %194 {offsets = [0, 0], sizes = [32, 128], strides = [1, 1]} : vector<33x128xf32> to vector<32x128xf32>
    %cst_58 = arith.constant dense<0.000000e+00> : vector<16x128xf32>
    %196 = tpu.matmul %192, %195, %cst_58 {dimension_numbers = #tpu.dot_dimension_numbers<[1], [0], [0], [1], [0, 0, 1, 1], [], []>} : vector<16x32xf32>, vector<32x128xf32>, vector<16x128xf32> -> vector<16x128xf32>
    %197 = vector.extract_strided_slice %194 {offsets = [32, 0], sizes = [1, 128], strides = [1, 1]} : vector<33x128xf32> to vector<1x128xf32>
    %198 = vector.broadcast %197 : vector<1x128xf32> to vector<16x128xf32>
    %199 = arith.addf %196, %198 : vector<16x128xf32>
    %200 = vector.extract_strided_slice %199 {offsets = [0, 0], sizes = [16, 32], strides = [1, 1]} : vector<16x128xf32> to vector<16x32xf32>
    %201 = vector.extract_strided_slice %199 {offsets = [0, 32], sizes = [16, 32], strides = [1, 1]} : vector<16x128xf32> to vector<16x32xf32>
    %202 = vector.extract_strided_slice %199 {offsets = [0, 64], sizes = [16, 32], strides = [1, 1]} : vector<16x128xf32> to vector<16x32xf32>
    %203 = vector.extract_strided_slice %199 {offsets = [0, 96], sizes = [16, 1], strides = [1, 1]} : vector<16x128xf32> to vector<16x1xf32>
    %204 = vector.extract_strided_slice %199 {offsets = [0, 97], sizes = [16, 1], strides = [1, 1]} : vector<16x128xf32> to vector<16x1xf32>
    %205 = vector.extract_strided_slice %200 {offsets = [0, 0], sizes = [8, 32], strides = [1, 1]} : vector<16x32xf32> to vector<8x32xf32>
    %206 = vector.extract_strided_slice %201 {offsets = [0, 0], sizes = [8, 32], strides = [1, 1]} : vector<16x32xf32> to vector<8x32xf32>
    %207 = vector.extract_strided_slice %202 {offsets = [0, 0], sizes = [8, 32], strides = [1, 1]} : vector<16x32xf32> to vector<8x32xf32>
    %208 = vector.extract_strided_slice %203 {offsets = [0, 0], sizes = [8, 1], strides = [1, 1]} : vector<16x1xf32> to vector<8x1xf32>
    %209 = vector.extract_strided_slice %204 {offsets = [0, 0], sizes = [8, 1], strides = [1, 1]} : vector<16x1xf32> to vector<8x1xf32>
    %cst_59 = arith.constant dense<0.000000e+00> : vector<8x8xf32>
    %210 = tpu.matmul %205, %206, %cst_59 {dimension_numbers = #tpu.dot_dimension_numbers<[1], [1], [0], [0], [0, 0, 1, 0], [], []>} : vector<8x32xf32>, vector<8x32xf32>, vector<8x8xf32> -> vector<8x8xf32>
    %cst_60 = arith.constant 0.176776692 : f32
    %211 = vector.broadcast %cst_60 : f32 to vector<8x8xf32>
    %212 = arith.mulf %210, %211 : vector<8x8xf32>
    %213 = tpu.transpose %208, [1, 0] : vector<8x1xf32> -> vector<1x8xf32>
    %214 = vector.broadcast %208 : vector<8x1xf32> to vector<8x8xf32>
    %215 = vector.broadcast %213 : vector<1x8xf32> to vector<8x8xf32>
    %216 = arith.subf %214, %215 : vector<8x8xf32>
    %217 = tpu.transpose %209, [1, 0] : vector<8x1xf32> -> vector<1x8xf32>
    %218 = vector.broadcast %209 : vector<8x1xf32> to vector<8x8xf32>
    %219 = vector.broadcast %217 : vector<1x8xf32> to vector<8x8xf32>
    %220 = arith.subf %218, %219 : vector<8x8xf32>
    %221 = arith.mulf %216, %216 : vector<8x8xf32>
    %222 = arith.mulf %220, %220 : vector<8x8xf32>
    %223 = arith.addf %221, %222 : vector<8x8xf32>
    %cst_61 = arith.constant 0.000000e+00 : f32
    %224 = vector.broadcast %cst_61 : f32 to vector<8x8xf32>
    %225 = arith.cmpf ogt, %223, %224 : vector<8x8xf32>
    %cst_62 = arith.constant 1.000000e+00 : f32
    %226 = vector.broadcast %cst_62 : f32 to vector<8x8xf32>
    %227 = arith.select %225, %223, %226 : vector<8x8xi1>, vector<8x8xf32>
    %cst_63 = arith.constant 0.000000e+00 : f32
    %228 = vector.broadcast %cst_63 : f32 to vector<8x8xf32>
    %229 = arith.cmpf ogt, %223, %228 : vector<8x8xf32>
    %230 = math.rsqrt %227 : vector<8x8xf32>
    %231 = arith.mulf %216, %230 : vector<8x8xf32>
    %cst_64 = arith.constant 1.000000e+00 : f32
    %232 = vector.broadcast %cst_64 : f32 to vector<8x8xf32>
    %233 = arith.select %229, %231, %232 : vector<8x8xi1>, vector<8x8xf32>
    %cst_65 = arith.constant 1.000000e+00 : f32
    %234 = vector.broadcast %cst_65 : f32 to vector<8x8xf32>
    %235 = arith.addf %234, %233 : vector<8x8xf32>
    %cst_66 = arith.constant 5.000000e-01 : f32
    %236 = vector.broadcast %cst_66 : f32 to vector<8x8xf32>
    %237 = arith.mulf %236, %235 : vector<8x8xf32>
    %238 = vector.shape_cast %223 : vector<8x8xf32> to vector<1x8x8xf32>
    %cst_67 = arith.constant dense<0.000000e+00> : vector<1xf32>
    %239 = vector.multi_reduction <add>, %238, %cst_67 [1, 2] : vector<1x8x8xf32> to vector<1xf32>
    %240 = vector.shape_cast %239 : vector<1xf32> to vector<1x1x1xf32>
    %241 = vector.extract %240[0, 0, 0] : f32 from vector<1x1x1xf32>
    %cst_68 = arith.constant 6.400000e+01 : f32
    %242 = arith.divf %241, %cst_68 : f32
    %243 = vector.broadcast %242 : f32 to vector<8x8xf32>
    %244 = arith.subf %223, %243 : vector<8x8xf32>
    %245 = arith.mulf %244, %244 : vector<8x8xf32>
    %246 = vector.shape_cast %245 : vector<8x8xf32> to vector<1x8x8xf32>
    %cst_69 = arith.constant dense<0.000000e+00> : vector<1xf32>
    %247 = vector.multi_reduction <add>, %246, %cst_69 [1, 2] : vector<1x8x8xf32> to vector<1xf32>
    %248 = vector.shape_cast %247 : vector<1xf32> to vector<1x1x1xf32>
    %249 = vector.extract %248[0, 0, 0] : f32 from vector<1x1x1xf32>
    %cst_70 = arith.constant 6.300000e+01 : f32
    %250 = arith.divf %249, %cst_70 : f32
    %251 = math.sqrt %250 : f32
    %cst_71 = arith.constant 1.250000e+00 : f32
    %252 = arith.mulf %cst_71, %251 : f32
    %253 = arith.addf %242, %252 : f32
    %254 = vector.broadcast %253 : f32 to vector<8x8xf32>
    %255 = arith.cmpf ole, %223, %254 : vector<8x8xf32>
    %256 = arith.andi %255, %2 : vector<8x8xi1>
    %cst_72 = arith.constant 0.000000e+00 : f32
    %257 = vector.broadcast %cst_72 : f32 to vector<8x8xf32>
    %258 = arith.select %256, %237, %257 : vector<8x8xi1>, vector<8x8xf32>
    %cst_73 = arith.constant 0.000000e+00 : f32
    %259 = vector.broadcast %cst_73 : f32 to vector<8x8xf32>
    %260 = arith.cmpf oeq, %258, %259 : vector<8x8xf32>
    %cst_74 = arith.constant -1.000000e+30 : f32
    %261 = vector.broadcast %cst_74 : f32 to vector<8x8xf32>
    %262 = arith.select %260, %261, %212 : vector<8x8xi1>, vector<8x8xf32>
    %cst_75 = arith.constant dense<0xFF800000> : vector<8xf32>
    %263 = vector.multi_reduction <maximumf>, %262, %cst_75 [1] : vector<8x8xf32> to vector<8xf32>
    %264 = vector.shape_cast %263 : vector<8xf32> to vector<8x1xf32>
    %265 = vector.broadcast %264 : vector<8x1xf32> to vector<8x8xf32>
    %266 = arith.subf %262, %265 : vector<8x8xf32>
    %267 = math.exp %266 : vector<8x8xf32>
    %cst_76 = arith.constant dense<0.000000e+00> : vector<8xf32>
    %268 = vector.multi_reduction <add>, %267, %cst_76 [1] : vector<8x8xf32> to vector<8xf32>
    %269 = vector.shape_cast %268 : vector<8xf32> to vector<8x1xf32>
    %270 = tpu.reciprocal %269 {approx = true} : vector<8x1xf32> -> vector<8x1xf32>
    %271 = vector.broadcast %270 : vector<8x1xf32> to vector<8x8xf32>
    %272 = arith.mulf %267, %271 : vector<8x8xf32>
    %cst_77 = arith.constant dense<0.000000e+00> : vector<8x32xf32>
    %273 = tpu.matmul %272, %207, %cst_77 {dimension_numbers = #tpu.dot_dimension_numbers<[1], [0], [0], [1], [0, 0, 1, 1], [], []>} : vector<8x8xf32>, vector<8x32xf32>, vector<8x32xf32> -> vector<8x32xf32>
    %274 = vector.extract_strided_slice %200 {offsets = [8, 0], sizes = [8, 32], strides = [1, 1]} : vector<16x32xf32> to vector<8x32xf32>
    %275 = vector.extract_strided_slice %201 {offsets = [8, 0], sizes = [8, 32], strides = [1, 1]} : vector<16x32xf32> to vector<8x32xf32>
    %276 = vector.extract_strided_slice %202 {offsets = [8, 0], sizes = [8, 32], strides = [1, 1]} : vector<16x32xf32> to vector<8x32xf32>
    %277 = vector.extract_strided_slice %203 {offsets = [8, 0], sizes = [8, 1], strides = [1, 1]} : vector<16x1xf32> to vector<8x1xf32>
    %278 = vector.extract_strided_slice %204 {offsets = [8, 0], sizes = [8, 1], strides = [1, 1]} : vector<16x1xf32> to vector<8x1xf32>
    %cst_78 = arith.constant dense<0.000000e+00> : vector<8x8xf32>
    %279 = tpu.matmul %274, %275, %cst_78 {dimension_numbers = #tpu.dot_dimension_numbers<[1], [1], [0], [0], [0, 0, 1, 0], [], []>} : vector<8x32xf32>, vector<8x32xf32>, vector<8x8xf32> -> vector<8x8xf32>
    %cst_79 = arith.constant 0.176776692 : f32
    %280 = vector.broadcast %cst_79 : f32 to vector<8x8xf32>
    %281 = arith.mulf %279, %280 : vector<8x8xf32>
    %282 = tpu.transpose %277, [1, 0] : vector<8x1xf32> -> vector<1x8xf32>
    %283 = vector.broadcast %277 : vector<8x1xf32> to vector<8x8xf32>
    %284 = vector.broadcast %282 : vector<1x8xf32> to vector<8x8xf32>
    %285 = arith.subf %283, %284 : vector<8x8xf32>
    %286 = tpu.transpose %278, [1, 0] : vector<8x1xf32> -> vector<1x8xf32>
    %287 = vector.broadcast %278 : vector<8x1xf32> to vector<8x8xf32>
    %288 = vector.broadcast %286 : vector<1x8xf32> to vector<8x8xf32>
    %289 = arith.subf %287, %288 : vector<8x8xf32>
    %290 = arith.mulf %285, %285 : vector<8x8xf32>
    %291 = arith.mulf %289, %289 : vector<8x8xf32>
    %292 = arith.addf %290, %291 : vector<8x8xf32>
    %cst_80 = arith.constant 0.000000e+00 : f32
    %293 = vector.broadcast %cst_80 : f32 to vector<8x8xf32>
    %294 = arith.cmpf ogt, %292, %293 : vector<8x8xf32>
    %cst_81 = arith.constant 1.000000e+00 : f32
    %295 = vector.broadcast %cst_81 : f32 to vector<8x8xf32>
    %296 = arith.select %294, %292, %295 : vector<8x8xi1>, vector<8x8xf32>
    %cst_82 = arith.constant 0.000000e+00 : f32
    %297 = vector.broadcast %cst_82 : f32 to vector<8x8xf32>
    %298 = arith.cmpf ogt, %292, %297 : vector<8x8xf32>
    %299 = math.rsqrt %296 : vector<8x8xf32>
    %300 = arith.mulf %285, %299 : vector<8x8xf32>
    %cst_83 = arith.constant 1.000000e+00 : f32
    %301 = vector.broadcast %cst_83 : f32 to vector<8x8xf32>
    %302 = arith.select %298, %300, %301 : vector<8x8xi1>, vector<8x8xf32>
    %cst_84 = arith.constant 1.000000e+00 : f32
    %303 = vector.broadcast %cst_84 : f32 to vector<8x8xf32>
    %304 = arith.addf %303, %302 : vector<8x8xf32>
    %cst_85 = arith.constant 5.000000e-01 : f32
    %305 = vector.broadcast %cst_85 : f32 to vector<8x8xf32>
    %306 = arith.mulf %305, %304 : vector<8x8xf32>
    %307 = vector.shape_cast %292 : vector<8x8xf32> to vector<1x8x8xf32>
    %cst_86 = arith.constant dense<0.000000e+00> : vector<1xf32>
    %308 = vector.multi_reduction <add>, %307, %cst_86 [1, 2] : vector<1x8x8xf32> to vector<1xf32>
    %309 = vector.shape_cast %308 : vector<1xf32> to vector<1x1x1xf32>
    %310 = vector.extract %309[0, 0, 0] : f32 from vector<1x1x1xf32>
    %cst_87 = arith.constant 6.400000e+01 : f32
    %311 = arith.divf %310, %cst_87 : f32
    %312 = vector.broadcast %311 : f32 to vector<8x8xf32>
    %313 = arith.subf %292, %312 : vector<8x8xf32>
    %314 = arith.mulf %313, %313 : vector<8x8xf32>
    %315 = vector.shape_cast %314 : vector<8x8xf32> to vector<1x8x8xf32>
    %cst_88 = arith.constant dense<0.000000e+00> : vector<1xf32>
    %316 = vector.multi_reduction <add>, %315, %cst_88 [1, 2] : vector<1x8x8xf32> to vector<1xf32>
    %317 = vector.shape_cast %316 : vector<1xf32> to vector<1x1x1xf32>
    %318 = vector.extract %317[0, 0, 0] : f32 from vector<1x1x1xf32>
    %cst_89 = arith.constant 6.300000e+01 : f32
    %319 = arith.divf %318, %cst_89 : f32
    %320 = math.sqrt %319 : f32
    %cst_90 = arith.constant 1.250000e+00 : f32
    %321 = arith.mulf %cst_90, %320 : f32
    %322 = arith.addf %311, %321 : f32
    %323 = vector.broadcast %322 : f32 to vector<8x8xf32>
    %324 = arith.cmpf ole, %292, %323 : vector<8x8xf32>
    %325 = arith.andi %324, %2 : vector<8x8xi1>
    %cst_91 = arith.constant 0.000000e+00 : f32
    %326 = vector.broadcast %cst_91 : f32 to vector<8x8xf32>
    %327 = arith.select %325, %306, %326 : vector<8x8xi1>, vector<8x8xf32>
    %cst_92 = arith.constant 0.000000e+00 : f32
    %328 = vector.broadcast %cst_92 : f32 to vector<8x8xf32>
    %329 = arith.cmpf oeq, %327, %328 : vector<8x8xf32>
    %cst_93 = arith.constant -1.000000e+30 : f32
    %330 = vector.broadcast %cst_93 : f32 to vector<8x8xf32>
    %331 = arith.select %329, %330, %281 : vector<8x8xi1>, vector<8x8xf32>
    %cst_94 = arith.constant dense<0xFF800000> : vector<8xf32>
    %332 = vector.multi_reduction <maximumf>, %331, %cst_94 [1] : vector<8x8xf32> to vector<8xf32>
    %333 = vector.shape_cast %332 : vector<8xf32> to vector<8x1xf32>
    %334 = vector.broadcast %333 : vector<8x1xf32> to vector<8x8xf32>
    %335 = arith.subf %331, %334 : vector<8x8xf32>
    %336 = math.exp %335 : vector<8x8xf32>
    %cst_95 = arith.constant dense<0.000000e+00> : vector<8xf32>
    %337 = vector.multi_reduction <add>, %336, %cst_95 [1] : vector<8x8xf32> to vector<8xf32>
    %338 = vector.shape_cast %337 : vector<8xf32> to vector<8x1xf32>
    %339 = tpu.reciprocal %338 {approx = true} : vector<8x1xf32> -> vector<8x1xf32>
    %340 = vector.broadcast %339 : vector<8x1xf32> to vector<8x8xf32>
    %341 = arith.mulf %336, %340 : vector<8x8xf32>
    %cst_96 = arith.constant dense<0.000000e+00> : vector<8x32xf32>
    %342 = tpu.matmul %341, %276, %cst_96 {dimension_numbers = #tpu.dot_dimension_numbers<[1], [0], [0], [1], [0, 0, 1, 1], [], []>} : vector<8x8xf32>, vector<8x32xf32>, vector<8x32xf32> -> vector<8x32xf32>
    %343 = tpu.concatenate %273, %342 in 0 : vector<8x32xf32>, vector<8x32xf32> -> vector<16x32xf32>
    %c1_97 = arith.constant 1 : index
    %c0_98 = arith.constant 0 : index
    %c0_99 = arith.constant 0 : index
    %344 = vector.load %arg5[%c1_97, %c0_98, %c0_99] : memref<3x33x32xf32, #tpu.memory_space<vmem>>, vector<1x33x32xf32>
    %345 = vector.shape_cast %344 : vector<1x33x32xf32> to vector<33x32xf32>
    %346 = vector.extract_strided_slice %345 {offsets = [0, 0], sizes = [32, 32], strides = [1, 1]} : vector<33x32xf32> to vector<32x32xf32>
    %cst_100 = arith.constant dense<0.000000e+00> : vector<16x32xf32>
    %347 = tpu.matmul %343, %346, %cst_100 {dimension_numbers = #tpu.dot_dimension_numbers<[1], [0], [0], [1], [0, 0, 1, 1], [], []>} : vector<16x32xf32>, vector<32x32xf32>, vector<16x32xf32> -> vector<16x32xf32>
    %348 = vector.extract_strided_slice %345 {offsets = [32, 0], sizes = [1, 32], strides = [1, 1]} : vector<33x32xf32> to vector<1x32xf32>
    %349 = vector.broadcast %348 : vector<1x32xf32> to vector<16x32xf32>
    %350 = arith.addf %347, %349 : vector<16x32xf32>
    %c1_101 = arith.constant 1 : index
    %c0_102 = arith.constant 0 : index
    %c0_103 = arith.constant 0 : index
    %351 = vector.load %arg6[%c1_101, %c0_102, %c0_103] : memref<3x3x32xf32, #tpu.memory_space<vmem>>, vector<1x3x32xf32>
    %352 = vector.shape_cast %351 : vector<1x3x32xf32> to vector<3x32xf32>
    %353 = arith.mulf %203, %203 : vector<16x1xf32>
    %354 = arith.mulf %204, %204 : vector<16x1xf32>
    %355 = arith.addf %353, %354 : vector<16x1xf32>
    %cst_104 = arith.constant 1.000000e-24 : f32
    %356 = vector.broadcast %cst_104 : f32 to vector<16x1xf32>
    %357 = arith.maximumf %355, %356 : vector<16x1xf32>
    %358 = math.rsqrt %357 : vector<16x1xf32>
    %359 = arith.mulf %203, %358 : vector<16x1xf32>
    %360 = arith.mulf %204, %358 : vector<16x1xf32>
    %361 = vector.extract_strided_slice %352 {offsets = [0, 0], sizes = [1, 32], strides = [1, 1]} : vector<3x32xf32> to vector<1x32xf32>
    %362 = vector.broadcast %359 : vector<16x1xf32> to vector<16x32xf32>
    %363 = vector.broadcast %361 : vector<1x32xf32> to vector<16x32xf32>
    %364 = arith.mulf %362, %363 : vector<16x32xf32>
    %365 = vector.extract_strided_slice %352 {offsets = [1, 0], sizes = [1, 32], strides = [1, 1]} : vector<3x32xf32> to vector<1x32xf32>
    %366 = vector.broadcast %360 : vector<16x1xf32> to vector<16x32xf32>
    %367 = vector.broadcast %365 : vector<1x32xf32> to vector<16x32xf32>
    %368 = arith.mulf %366, %367 : vector<16x32xf32>
    %369 = arith.addf %364, %368 : vector<16x32xf32>
    %370 = vector.extract_strided_slice %352 {offsets = [2, 0], sizes = [1, 32], strides = [1, 1]} : vector<3x32xf32> to vector<1x32xf32>
    %371 = vector.broadcast %370 : vector<1x32xf32> to vector<16x32xf32>
    %372 = arith.addf %369, %371 : vector<16x32xf32>
    %373 = arith.addf %192, %350 : vector<16x32xf32>
    %cst_105 = arith.constant 1.000000e-01 : f32
    %374 = vector.broadcast %cst_105 : f32 to vector<16x32xf32>
    %375 = arith.mulf %374, %372 : vector<16x32xf32>
    %376 = arith.addf %373, %375 : vector<16x32xf32>
    %c2 = arith.constant 2 : index
    %c0_106 = arith.constant 0 : index
    %c0_107 = arith.constant 0 : index
    %377 = vector.load %arg4[%c2, %c0_106, %c0_107] : memref<3x33x128xf32, #tpu.memory_space<vmem>>, vector<1x33x128xf32>
    %378 = vector.shape_cast %377 : vector<1x33x128xf32> to vector<33x128xf32>
    %379 = vector.extract_strided_slice %378 {offsets = [0, 0], sizes = [32, 128], strides = [1, 1]} : vector<33x128xf32> to vector<32x128xf32>
    %cst_108 = arith.constant dense<0.000000e+00> : vector<16x128xf32>
    %380 = tpu.matmul %376, %379, %cst_108 {dimension_numbers = #tpu.dot_dimension_numbers<[1], [0], [0], [1], [0, 0, 1, 1], [], []>} : vector<16x32xf32>, vector<32x128xf32>, vector<16x128xf32> -> vector<16x128xf32>
    %381 = vector.extract_strided_slice %378 {offsets = [32, 0], sizes = [1, 128], strides = [1, 1]} : vector<33x128xf32> to vector<1x128xf32>
    %382 = vector.broadcast %381 : vector<1x128xf32> to vector<16x128xf32>
    %383 = arith.addf %380, %382 : vector<16x128xf32>
    %384 = vector.extract_strided_slice %383 {offsets = [0, 0], sizes = [16, 32], strides = [1, 1]} : vector<16x128xf32> to vector<16x32xf32>
    %385 = vector.extract_strided_slice %383 {offsets = [0, 32], sizes = [16, 32], strides = [1, 1]} : vector<16x128xf32> to vector<16x32xf32>
    %386 = vector.extract_strided_slice %383 {offsets = [0, 64], sizes = [16, 32], strides = [1, 1]} : vector<16x128xf32> to vector<16x32xf32>
    %387 = vector.extract_strided_slice %383 {offsets = [0, 96], sizes = [16, 1], strides = [1, 1]} : vector<16x128xf32> to vector<16x1xf32>
    %388 = vector.extract_strided_slice %383 {offsets = [0, 97], sizes = [16, 1], strides = [1, 1]} : vector<16x128xf32> to vector<16x1xf32>
    %389 = vector.extract_strided_slice %384 {offsets = [0, 0], sizes = [8, 32], strides = [1, 1]} : vector<16x32xf32> to vector<8x32xf32>
    %390 = vector.extract_strided_slice %385 {offsets = [0, 0], sizes = [8, 32], strides = [1, 1]} : vector<16x32xf32> to vector<8x32xf32>
    %391 = vector.extract_strided_slice %386 {offsets = [0, 0], sizes = [8, 32], strides = [1, 1]} : vector<16x32xf32> to vector<8x32xf32>
    %392 = vector.extract_strided_slice %387 {offsets = [0, 0], sizes = [8, 1], strides = [1, 1]} : vector<16x1xf32> to vector<8x1xf32>
    %393 = vector.extract_strided_slice %388 {offsets = [0, 0], sizes = [8, 1], strides = [1, 1]} : vector<16x1xf32> to vector<8x1xf32>
    %cst_109 = arith.constant dense<0.000000e+00> : vector<8x8xf32>
    %394 = tpu.matmul %389, %390, %cst_109 {dimension_numbers = #tpu.dot_dimension_numbers<[1], [1], [0], [0], [0, 0, 1, 0], [], []>} : vector<8x32xf32>, vector<8x32xf32>, vector<8x8xf32> -> vector<8x8xf32>
    %cst_110 = arith.constant 0.176776692 : f32
    %395 = vector.broadcast %cst_110 : f32 to vector<8x8xf32>
    %396 = arith.mulf %394, %395 : vector<8x8xf32>
    %397 = tpu.transpose %392, [1, 0] : vector<8x1xf32> -> vector<1x8xf32>
    %398 = vector.broadcast %392 : vector<8x1xf32> to vector<8x8xf32>
    %399 = vector.broadcast %397 : vector<1x8xf32> to vector<8x8xf32>
    %400 = arith.subf %398, %399 : vector<8x8xf32>
    %401 = tpu.transpose %393, [1, 0] : vector<8x1xf32> -> vector<1x8xf32>
    %402 = vector.broadcast %393 : vector<8x1xf32> to vector<8x8xf32>
    %403 = vector.broadcast %401 : vector<1x8xf32> to vector<8x8xf32>
    %404 = arith.subf %402, %403 : vector<8x8xf32>
    %405 = arith.mulf %400, %400 : vector<8x8xf32>
    %406 = arith.mulf %404, %404 : vector<8x8xf32>
    %407 = arith.addf %405, %406 : vector<8x8xf32>
    %cst_111 = arith.constant 0.000000e+00 : f32
    %408 = vector.broadcast %cst_111 : f32 to vector<8x8xf32>
    %409 = arith.cmpf ogt, %407, %408 : vector<8x8xf32>
    %cst_112 = arith.constant 1.000000e+00 : f32
    %410 = vector.broadcast %cst_112 : f32 to vector<8x8xf32>
    %411 = arith.select %409, %407, %410 : vector<8x8xi1>, vector<8x8xf32>
    %cst_113 = arith.constant 0.000000e+00 : f32
    %412 = vector.broadcast %cst_113 : f32 to vector<8x8xf32>
    %413 = arith.cmpf ogt, %407, %412 : vector<8x8xf32>
    %414 = math.rsqrt %411 : vector<8x8xf32>
    %415 = arith.mulf %400, %414 : vector<8x8xf32>
    %cst_114 = arith.constant 1.000000e+00 : f32
    %416 = vector.broadcast %cst_114 : f32 to vector<8x8xf32>
    %417 = arith.select %413, %415, %416 : vector<8x8xi1>, vector<8x8xf32>
    %cst_115 = arith.constant 1.000000e+00 : f32
    %418 = vector.broadcast %cst_115 : f32 to vector<8x8xf32>
    %419 = arith.addf %418, %417 : vector<8x8xf32>
    %cst_116 = arith.constant 5.000000e-01 : f32
    %420 = vector.broadcast %cst_116 : f32 to vector<8x8xf32>
    %421 = arith.mulf %420, %419 : vector<8x8xf32>
    %422 = vector.shape_cast %407 : vector<8x8xf32> to vector<1x8x8xf32>
    %cst_117 = arith.constant dense<0.000000e+00> : vector<1xf32>
    %423 = vector.multi_reduction <add>, %422, %cst_117 [1, 2] : vector<1x8x8xf32> to vector<1xf32>
    %424 = vector.shape_cast %423 : vector<1xf32> to vector<1x1x1xf32>
    %425 = vector.extract %424[0, 0, 0] : f32 from vector<1x1x1xf32>
    %cst_118 = arith.constant 6.400000e+01 : f32
    %426 = arith.divf %425, %cst_118 : f32
    %427 = vector.broadcast %426 : f32 to vector<8x8xf32>
    %428 = arith.subf %407, %427 : vector<8x8xf32>
    %429 = arith.mulf %428, %428 : vector<8x8xf32>
    %430 = vector.shape_cast %429 : vector<8x8xf32> to vector<1x8x8xf32>
    %cst_119 = arith.constant dense<0.000000e+00> : vector<1xf32>
    %431 = vector.multi_reduction <add>, %430, %cst_119 [1, 2] : vector<1x8x8xf32> to vector<1xf32>
    %432 = vector.shape_cast %431 : vector<1xf32> to vector<1x1x1xf32>
    %433 = vector.extract %432[0, 0, 0] : f32 from vector<1x1x1xf32>
    %cst_120 = arith.constant 6.300000e+01 : f32
    %434 = arith.divf %433, %cst_120 : f32
    %435 = math.sqrt %434 : f32
    %cst_121 = arith.constant 1.250000e+00 : f32
    %436 = arith.mulf %cst_121, %435 : f32
    %437 = arith.addf %426, %436 : f32
    %438 = vector.broadcast %437 : f32 to vector<8x8xf32>
    %439 = arith.cmpf ole, %407, %438 : vector<8x8xf32>
    %440 = arith.andi %439, %2 : vector<8x8xi1>
    %cst_122 = arith.constant 0.000000e+00 : f32
    %441 = vector.broadcast %cst_122 : f32 to vector<8x8xf32>
    %442 = arith.select %440, %421, %441 : vector<8x8xi1>, vector<8x8xf32>
    %cst_123 = arith.constant 0.000000e+00 : f32
    %443 = vector.broadcast %cst_123 : f32 to vector<8x8xf32>
    %444 = arith.cmpf oeq, %442, %443 : vector<8x8xf32>
    %cst_124 = arith.constant -1.000000e+30 : f32
    %445 = vector.broadcast %cst_124 : f32 to vector<8x8xf32>
    %446 = arith.select %444, %445, %396 : vector<8x8xi1>, vector<8x8xf32>
    %cst_125 = arith.constant dense<0xFF800000> : vector<8xf32>
    %447 = vector.multi_reduction <maximumf>, %446, %cst_125 [1] : vector<8x8xf32> to vector<8xf32>
    %448 = vector.shape_cast %447 : vector<8xf32> to vector<8x1xf32>
    %449 = vector.broadcast %448 : vector<8x1xf32> to vector<8x8xf32>
    %450 = arith.subf %446, %449 : vector<8x8xf32>
    %451 = math.exp %450 : vector<8x8xf32>
    %cst_126 = arith.constant dense<0.000000e+00> : vector<8xf32>
    %452 = vector.multi_reduction <add>, %451, %cst_126 [1] : vector<8x8xf32> to vector<8xf32>
    %453 = vector.shape_cast %452 : vector<8xf32> to vector<8x1xf32>
    %454 = tpu.reciprocal %453 {approx = true} : vector<8x1xf32> -> vector<8x1xf32>
    %455 = vector.broadcast %454 : vector<8x1xf32> to vector<8x8xf32>
    %456 = arith.mulf %451, %455 : vector<8x8xf32>
    %cst_127 = arith.constant dense<0.000000e+00> : vector<8x32xf32>
    %457 = tpu.matmul %456, %391, %cst_127 {dimension_numbers = #tpu.dot_dimension_numbers<[1], [0], [0], [1], [0, 0, 1, 1], [], []>} : vector<8x8xf32>, vector<8x32xf32>, vector<8x32xf32> -> vector<8x32xf32>
    %458 = vector.extract_strided_slice %384 {offsets = [8, 0], sizes = [8, 32], strides = [1, 1]} : vector<16x32xf32> to vector<8x32xf32>
    %459 = vector.extract_strided_slice %385 {offsets = [8, 0], sizes = [8, 32], strides = [1, 1]} : vector<16x32xf32> to vector<8x32xf32>
    %460 = vector.extract_strided_slice %386 {offsets = [8, 0], sizes = [8, 32], strides = [1, 1]} : vector<16x32xf32> to vector<8x32xf32>
    %461 = vector.extract_strided_slice %387 {offsets = [8, 0], sizes = [8, 1], strides = [1, 1]} : vector<16x1xf32> to vector<8x1xf32>
    %462 = vector.extract_strided_slice %388 {offsets = [8, 0], sizes = [8, 1], strides = [1, 1]} : vector<16x1xf32> to vector<8x1xf32>
    %cst_128 = arith.constant dense<0.000000e+00> : vector<8x8xf32>
    %463 = tpu.matmul %458, %459, %cst_128 {dimension_numbers = #tpu.dot_dimension_numbers<[1], [1], [0], [0], [0, 0, 1, 0], [], []>} : vector<8x32xf32>, vector<8x32xf32>, vector<8x8xf32> -> vector<8x8xf32>
    %cst_129 = arith.constant 0.176776692 : f32
    %464 = vector.broadcast %cst_129 : f32 to vector<8x8xf32>
    %465 = arith.mulf %463, %464 : vector<8x8xf32>
    %466 = tpu.transpose %461, [1, 0] : vector<8x1xf32> -> vector<1x8xf32>
    %467 = vector.broadcast %461 : vector<8x1xf32> to vector<8x8xf32>
    %468 = vector.broadcast %466 : vector<1x8xf32> to vector<8x8xf32>
    %469 = arith.subf %467, %468 : vector<8x8xf32>
    %470 = tpu.transpose %462, [1, 0] : vector<8x1xf32> -> vector<1x8xf32>
    %471 = vector.broadcast %462 : vector<8x1xf32> to vector<8x8xf32>
    %472 = vector.broadcast %470 : vector<1x8xf32> to vector<8x8xf32>
    %473 = arith.subf %471, %472 : vector<8x8xf32>
    %474 = arith.mulf %469, %469 : vector<8x8xf32>
    %475 = arith.mulf %473, %473 : vector<8x8xf32>
    %476 = arith.addf %474, %475 : vector<8x8xf32>
    %cst_130 = arith.constant 0.000000e+00 : f32
    %477 = vector.broadcast %cst_130 : f32 to vector<8x8xf32>
    %478 = arith.cmpf ogt, %476, %477 : vector<8x8xf32>
    %cst_131 = arith.constant 1.000000e+00 : f32
    %479 = vector.broadcast %cst_131 : f32 to vector<8x8xf32>
    %480 = arith.select %478, %476, %479 : vector<8x8xi1>, vector<8x8xf32>
    %cst_132 = arith.constant 0.000000e+00 : f32
    %481 = vector.broadcast %cst_132 : f32 to vector<8x8xf32>
    %482 = arith.cmpf ogt, %476, %481 : vector<8x8xf32>
    %483 = math.rsqrt %480 : vector<8x8xf32>
    %484 = arith.mulf %469, %483 : vector<8x8xf32>
    %cst_133 = arith.constant 1.000000e+00 : f32
    %485 = vector.broadcast %cst_133 : f32 to vector<8x8xf32>
    %486 = arith.select %482, %484, %485 : vector<8x8xi1>, vector<8x8xf32>
    %cst_134 = arith.constant 1.000000e+00 : f32
    %487 = vector.broadcast %cst_134 : f32 to vector<8x8xf32>
    %488 = arith.addf %487, %486 : vector<8x8xf32>
    %cst_135 = arith.constant 5.000000e-01 : f32
    %489 = vector.broadcast %cst_135 : f32 to vector<8x8xf32>
    %490 = arith.mulf %489, %488 : vector<8x8xf32>
    %491 = vector.shape_cast %476 : vector<8x8xf32> to vector<1x8x8xf32>
    %cst_136 = arith.constant dense<0.000000e+00> : vector<1xf32>
    %492 = vector.multi_reduction <add>, %491, %cst_136 [1, 2] : vector<1x8x8xf32> to vector<1xf32>
    %493 = vector.shape_cast %492 : vector<1xf32> to vector<1x1x1xf32>
    %494 = vector.extract %493[0, 0, 0] : f32 from vector<1x1x1xf32>
    %cst_137 = arith.constant 6.400000e+01 : f32
    %495 = arith.divf %494, %cst_137 : f32
    %496 = vector.broadcast %495 : f32 to vector<8x8xf32>
    %497 = arith.subf %476, %496 : vector<8x8xf32>
    %498 = arith.mulf %497, %497 : vector<8x8xf32>
    %499 = vector.shape_cast %498 : vector<8x8xf32> to vector<1x8x8xf32>
    %cst_138 = arith.constant dense<0.000000e+00> : vector<1xf32>
    %500 = vector.multi_reduction <add>, %499, %cst_138 [1, 2] : vector<1x8x8xf32> to vector<1xf32>
    %501 = vector.shape_cast %500 : vector<1xf32> to vector<1x1x1xf32>
    %502 = vector.extract %501[0, 0, 0] : f32 from vector<1x1x1xf32>
    %cst_139 = arith.constant 6.300000e+01 : f32
    %503 = arith.divf %502, %cst_139 : f32
    %504 = math.sqrt %503 : f32
    %cst_140 = arith.constant 1.250000e+00 : f32
    %505 = arith.mulf %cst_140, %504 : f32
    %506 = arith.addf %495, %505 : f32
    %507 = vector.broadcast %506 : f32 to vector<8x8xf32>
    %508 = arith.cmpf ole, %476, %507 : vector<8x8xf32>
    %509 = arith.andi %508, %2 : vector<8x8xi1>
    %cst_141 = arith.constant 0.000000e+00 : f32
    %510 = vector.broadcast %cst_141 : f32 to vector<8x8xf32>
    %511 = arith.select %509, %490, %510 : vector<8x8xi1>, vector<8x8xf32>
    %cst_142 = arith.constant 0.000000e+00 : f32
    %512 = vector.broadcast %cst_142 : f32 to vector<8x8xf32>
    %513 = arith.cmpf oeq, %511, %512 : vector<8x8xf32>
    %cst_143 = arith.constant -1.000000e+30 : f32
    %514 = vector.broadcast %cst_143 : f32 to vector<8x8xf32>
    %515 = arith.select %513, %514, %465 : vector<8x8xi1>, vector<8x8xf32>
    %cst_144 = arith.constant dense<0xFF800000> : vector<8xf32>
    %516 = vector.multi_reduction <maximumf>, %515, %cst_144 [1] : vector<8x8xf32> to vector<8xf32>
    %517 = vector.shape_cast %516 : vector<8xf32> to vector<8x1xf32>
    %518 = vector.broadcast %517 : vector<8x1xf32> to vector<8x8xf32>
    %519 = arith.subf %515, %518 : vector<8x8xf32>
    %520 = math.exp %519 : vector<8x8xf32>
    %cst_145 = arith.constant dense<0.000000e+00> : vector<8xf32>
    %521 = vector.multi_reduction <add>, %520, %cst_145 [1] : vector<8x8xf32> to vector<8xf32>
    %522 = vector.shape_cast %521 : vector<8xf32> to vector<8x1xf32>
    %523 = tpu.reciprocal %522 {approx = true} : vector<8x1xf32> -> vector<8x1xf32>
    %524 = vector.broadcast %523 : vector<8x1xf32> to vector<8x8xf32>
    %525 = arith.mulf %520, %524 : vector<8x8xf32>
    %cst_146 = arith.constant dense<0.000000e+00> : vector<8x32xf32>
    %526 = tpu.matmul %525, %460, %cst_146 {dimension_numbers = #tpu.dot_dimension_numbers<[1], [0], [0], [1], [0, 0, 1, 1], [], []>} : vector<8x8xf32>, vector<8x32xf32>, vector<8x32xf32> -> vector<8x32xf32>
    %527 = tpu.concatenate %457, %526 in 0 : vector<8x32xf32>, vector<8x32xf32> -> vector<16x32xf32>
    %c2_147 = arith.constant 2 : index
    %c0_148 = arith.constant 0 : index
    %c0_149 = arith.constant 0 : index
    %528 = vector.load %arg5[%c2_147, %c0_148, %c0_149] : memref<3x33x32xf32, #tpu.memory_space<vmem>>, vector<1x33x32xf32>
    %529 = vector.shape_cast %528 : vector<1x33x32xf32> to vector<33x32xf32>
    %530 = vector.extract_strided_slice %529 {offsets = [0, 0], sizes = [32, 32], strides = [1, 1]} : vector<33x32xf32> to vector<32x32xf32>
    %cst_150 = arith.constant dense<0.000000e+00> : vector<16x32xf32>
    %531 = tpu.matmul %527, %530, %cst_150 {dimension_numbers = #tpu.dot_dimension_numbers<[1], [0], [0], [1], [0, 0, 1, 1], [], []>} : vector<16x32xf32>, vector<32x32xf32>, vector<16x32xf32> -> vector<16x32xf32>
    %532 = vector.extract_strided_slice %529 {offsets = [32, 0], sizes = [1, 32], strides = [1, 1]} : vector<33x32xf32> to vector<1x32xf32>
    %533 = vector.broadcast %532 : vector<1x32xf32> to vector<16x32xf32>
    %534 = arith.addf %531, %533 : vector<16x32xf32>
    %c2_151 = arith.constant 2 : index
    %c0_152 = arith.constant 0 : index
    %c0_153 = arith.constant 0 : index
    %535 = vector.load %arg6[%c2_151, %c0_152, %c0_153] : memref<3x3x32xf32, #tpu.memory_space<vmem>>, vector<1x3x32xf32>
    %536 = vector.shape_cast %535 : vector<1x3x32xf32> to vector<3x32xf32>
    %537 = arith.mulf %387, %387 : vector<16x1xf32>
    %538 = arith.mulf %388, %388 : vector<16x1xf32>
    %539 = arith.addf %537, %538 : vector<16x1xf32>
    %cst_154 = arith.constant 1.000000e-24 : f32
    %540 = vector.broadcast %cst_154 : f32 to vector<16x1xf32>
    %541 = arith.maximumf %539, %540 : vector<16x1xf32>
    %542 = math.rsqrt %541 : vector<16x1xf32>
    %543 = arith.mulf %387, %542 : vector<16x1xf32>
    %544 = arith.mulf %388, %542 : vector<16x1xf32>
    %545 = vector.extract_strided_slice %536 {offsets = [0, 0], sizes = [1, 32], strides = [1, 1]} : vector<3x32xf32> to vector<1x32xf32>
    %546 = vector.broadcast %543 : vector<16x1xf32> to vector<16x32xf32>
    %547 = vector.broadcast %545 : vector<1x32xf32> to vector<16x32xf32>
    %548 = arith.mulf %546, %547 : vector<16x32xf32>
    %549 = vector.extract_strided_slice %536 {offsets = [1, 0], sizes = [1, 32], strides = [1, 1]} : vector<3x32xf32> to vector<1x32xf32>
    %550 = vector.broadcast %544 : vector<16x1xf32> to vector<16x32xf32>
    %551 = vector.broadcast %549 : vector<1x32xf32> to vector<16x32xf32>
    %552 = arith.mulf %550, %551 : vector<16x32xf32>
    %553 = arith.addf %548, %552 : vector<16x32xf32>
    %554 = vector.extract_strided_slice %536 {offsets = [2, 0], sizes = [1, 32], strides = [1, 1]} : vector<3x32xf32> to vector<1x32xf32>
    %555 = vector.broadcast %554 : vector<1x32xf32> to vector<16x32xf32>
    %556 = arith.addf %553, %555 : vector<16x32xf32>
    %557 = arith.addf %376, %534 : vector<16x32xf32>
    %cst_155 = arith.constant 1.000000e-01 : f32
    %558 = vector.broadcast %cst_155 : f32 to vector<16x32xf32>
    %559 = arith.mulf %558, %556 : vector<16x32xf32>
    %560 = arith.addf %557, %559 : vector<16x32xf32>
    %c0_156 = arith.constant 0 : index
    %c0_157 = arith.constant 0 : index
    %561 = vector.load %arg7[%c0_156, %c0_157] : memref<32x128xf32, #tpu.memory_space<vmem>>, vector<32x128xf32>
    %cst_158 = arith.constant dense<0.000000e+00> : vector<16x128xf32>
    %562 = tpu.matmul %560, %561, %cst_158 {dimension_numbers = #tpu.dot_dimension_numbers<[1], [0], [0], [1], [0, 0, 1, 1], [], []>} : vector<16x32xf32>, vector<32x128xf32>, vector<16x128xf32> -> vector<16x128xf32>
    %c0_159 = arith.constant 0 : index
    %c0_160 = arith.constant 0 : index
    %563 = vector.load %arg8[%c0_159, %c0_160] : memref<1x128xf32, #tpu.memory_space<vmem>>, vector<1x128xf32>
    %564 = vector.broadcast %563 : vector<1x128xf32> to vector<16x128xf32>
    %565 = arith.addf %562, %564 : vector<16x128xf32>
    %c0_161 = arith.constant 0 : index
    %c0_162 = arith.constant 0 : index
    %566 = vector.load %arg9[%c0_161, %c0_162] : memref<16x128xf32, #tpu.memory_space<vmem>>, vector<16x128xf32>
    tpu.vector_store %arg9[%c0_161, %c0_162], %565 {strides = array<i32>} : memref<16x128xf32, #tpu.memory_space<vmem>>, vector<16x128xf32>,
    return
  }
  func.func @transform_0(%arg0: i32) -> (i32, i32) {
    %c0_i32 = arith.constant 0 : i32
    %c0_i32_0 = arith.constant 0 : i32
    %c0_i32_1 = arith.constant 0 : i32
    return %c0_i32, %c0_i32_0 : i32, i32
  }
  func.func @transform_1(%arg0: i32) -> (i32, i32) {
    %c0_i32 = arith.constant 0 : i32
    %c0_i32_0 = arith.constant 0 : i32
    %c0_i32_1 = arith.constant 0 : i32
    return %c0_i32, %c0_i32_0 : i32, i32
  }
  func.func @transform_2(%arg0: i32) -> (i32, i32) {
    %c0_i32 = arith.constant 0 : i32
    %c0_i32_0 = arith.constant 0 : i32
    %c0_i32_1 = arith.constant 0 : i32
    return %c0_i32, %c0_i32_0 : i32, i32
  }
  func.func @transform_3(%arg0: i32) -> (i32, i32, i32) {
    %c0_i32 = arith.constant 0 : i32
    %c0_i32_0 = arith.constant 0 : i32
    %c0_i32_1 = arith.constant 0 : i32
    %c0_i32_2 = arith.constant 0 : i32
    return %c0_i32, %c0_i32_0, %c0_i32_1 : i32, i32, i32
  }
  func.func @transform_4(%arg0: i32) -> (i32, i32, i32) {
    %c0_i32 = arith.constant 0 : i32
    %c0_i32_0 = arith.constant 0 : i32
    %c0_i32_1 = arith.constant 0 : i32
    %c0_i32_2 = arith.constant 0 : i32
    return %c0_i32, %c0_i32_0, %c0_i32_1 : i32, i32, i32
  }
  func.func @transform_5(%arg0: i32) -> (i32, i32, i32) {
    %c0_i32 = arith.constant 0 : i32
    %c0_i32_0 = arith.constant 0 : i32
    %c0_i32_1 = arith.constant 0 : i32
    %c0_i32_2 = arith.constant 0 : i32
    return %c0_i32, %c0_i32_0, %c0_i32_1 : i32, i32, i32
  }
  func.func @transform_6(%arg0: i32) -> (i32, i32) {
    %c0_i32 = arith.constant 0 : i32
    %c0_i32_0 = arith.constant 0 : i32
    %c0_i32_1 = arith.constant 0 : i32
    return %c0_i32, %c0_i32_0 : i32, i32
  }
  func.func @transform_7(%arg0: i32) -> (i32, i32) {
    %c0_i32 = arith.constant 0 : i32
    %c0_i32_0 = arith.constant 0 : i32
    %c0_i32_1 = arith.constant 0 : i32
    return %c0_i32, %c0_i32_0 : i32, i32
  }
  func.func @transform_8(%arg0: i32) -> (i32, i32) {
    %c0_i32 = arith.constant 0 : i32
    %c0_i32_0 = arith.constant 0 : i32
    %c0_i32_1 = arith.constant 0 : i32
    return %c0_i32, %c0_i32_0 : i32, i32
  }
}

</mosaic_0001>

<bundles_post_ra>
// kernel: model_forward.1
= control target key start
LH: loop header
LB: loop body
LE: loop exit
PB: predicated region body
PF: predicated region fallthrough
CT: control target
= control target key end

     0   :  { %vm51_vm0 = vcmask 1043456   ;;  %vm44_vm1 = vcmask 31744   ;;  %vm139_vm2 = vcmask 261120   ;;  %v3245_v12 = vmov 96   ;;  %s3248_s21 = smov 31   ;;  %s3251_s22 = smov 96   ;;  %s3835_s1 = inlined_call_operand.vmem [shape: f32[4,32], index: 1, kind: input, shape index: {}]   ;;  %s3836_s0 = inlined_call_operand.vmem [shape: f32[16,4], index: 0, kind: input, shape index: {}]   ;;  %s3837_s3 = inlined_call_operand.vmem [shape: f32[3,33,128], index: 3, kind: input, shape index: {}]   ;;  %s3838_s2 = inlined_call_operand.vmem [shape: f32[1,32], index: 2, kind: input, shape index: {}]   ;;  %s3839_s4 = inlined_call_operand.vmem [shape: f32[3,33,32], index: 4, kind: input, shape index: {}]   ;;  %s3840_s5 = inlined_call_operand.vmem [shape: f32[3,3,32], index: 5, kind: input, shape index: {}]   ;;  %s3841_s6 = inlined_call_operand.vmem [shape: f32[32,128], index: 6, kind: input, shape index: {}]   ;;  %s3842_s7 = inlined_call_operand.vmem [shape: f32[1,128], index: 7, kind: input, shape index: {}]   ;;  %s3843_s8 = inlined_call_operand.vmem [shape: f32[16,128], index: 8, kind: output, shape index: {}]  }
   0x1   :  { %v36_v0 = vld [vmem:[%s3835_s1] sm:$0xf]  ;;  %v35_v2 = vld [vmem:[%s3836_s0 + $0x8] sm:$0xff]  ;;  %v133_v3 = vld [vmem:[%s3837_s3 + $0x18] sm:$0xff]  ;;  %3177 = vset.pattern.permute.xlu1 %v3245_v12  ;;  %v3247_v18 = vmov 97   ;;  %v29_v21 = vlaneseq  ;;  %vm397_vm3 = vcmask 64512  }
   0x2   :  { %v34_v1 = vld [vmem:[%s3836_s0] sm:$0xff]  ;;  %2989 = vmatprep.subr.msk.mxu0 %vm51_vm0, %v36_v0  ;;  %2994 = vmatprep.subr.mxu1 %v133_v3  ;;  %v132_v4 = vld [vmem:[%s3837_s3 + $0x10] sm:$0xff]  ;;  %v131_v5 = vld [vmem:[%s3837_s3 + $0x8] sm:$0xff]  ;;  %v3249_v38 = vmov 0.0   ;;  %vm3250_vm4 = vmmov 0   ;;  %s3252_s30 = smov 64  }
   0x3   :  { %2991 = vmatprep.mubr.msk.f32.mxu0 %vm44_vm1, %v34_v1  ;;  %2990 = vmatpush3.msk.msra.mxu0 %vm51_vm0, %v36_v0  ;;  %v130_v6 = vld [vmem:[%s3837_s3] sm:$0xff]  ;;  %v3355_v22 = vshrl.u32 %v29_v21, 7  ;;  %s3253_s15 = smov 127   ;;  %s3254_s0 = smov 1  }
   0x4   :  { %2992 = vmatmul.mubr.msk.f32.vlgmr.msra.gmra.mxu0 %vm44_vm1, %v35_v2  ;;  %2995 = vmatpush3.msra.mxu1 %v133_v3  ;;  %v2855_v8 = vld [vmem:[%s3838_s2] ss:$0 sm:$0xff]  ;;  %s3246_s2 = smov 32  }
   0x5   :  { %2996 = vmatprep.subr.mxu1 %v132_v4  ;;  %v2859_v13 = vld [vmem:[%s3837_s3 + $0x20] ss:$0 sm:$0xff]  ;;  %v3358_v24 = vsub.s32 0, %v3355_v22  ;;  %3005 = vmatprep.subr.mxu0 %v3249_v38 }
   0x6   :  { %2997 = vmatpush3.msra.mxu1 %v132_v4  ;;  %3007 = vmatprep.mubr.msk.f32.mxu0 %vm3250_vm4, %v3249_v38 }
   0x7   :  { %2998 = vmatprep.subr.mxu1 %v131_v5 }
   0x8   :  { %2999 = vmatpush3.msra.mxu1 %v131_v5 }
   0x9   :  { %3000 = vmatprep.subr.mxu1 %v130_v6 }
   0xa   :  { %3001 = vmatpush3.msra.mxu1 %v130_v6 }
   0xb   :  { %3015 = vmatprep.subr.mxu1 %v3249_v38 }
  0xc4   :  { %v2993_v7 = vpop.f32.mrf.mxu0 }
  0xc5   :  { %v3326_v11 = vadd.f32 %v2993_v7, %v2855_v8 }
  0xc6   :  { %v121_v9 = vpop.f32.mrf.mxu0 }
  0xc7   :  { %v3324_v10 = vadd.f32 %v2855_v8, %v121_v9 }
  0xc9   :  { %3002 = vmatprep.mubr.msk.f32.mxu1 %vm139_vm2, %v3324_v10 }
  0xca   :  { %3003 = vmatmul.mubr.msk.f32.vlgmr.msra.gmra.mxu1 %vm139_vm2, %v3326_v11 }
  0xcb   :  { %3017 = vmatprep.mubr.msk.f32.mxu1 %vm3250_vm4, %v3249_v38 }
 0x18a   :  { %v3004_v14 = vpop.f32.mrf.mxu1 }
 0x18b   :  { %v3336_v15 = vadd.f32 %v3004_v14, %v2859_v13 }
 0x18c   :  { %v212_v16 = vpop.f32.mrf.mxu1 }
 0x18d   :  { %v3338_v17 = vadd.f32 %v2859_v13, %v212_v16 }
 0x18f   :  { %335 = vperm.xlu1 %3177, %v3338_v17   ;;  %299 = vrot.lane.b32.xlu0 %v3338_v17, %s3246_s2 }
 0x193   :  { %3178 = vset.pattern.permute.xlu1 %v3247_v18  ;;  %343 = vrot.lane.b32.xlu0 %v3338_v17, %s3248_s21 }
 0x194   :  { %379 = vperm.xlu1 %3178, %v3338_v17  }
 0x201   :  { %v300_v19 = vpop.permute.xlu0 %299 }
 0x202   :  { %302 = vxpose.xlu0.b32.start.end [1/1] (short) (narrow) %v300_v19, 8 }
 0x205   :  { %v344_v20 = vpop.permute.xlu0 %343 }
 0x206   :  { %346 = vxpose.xlu1.b32.start.end [1/1] (short) (narrow) %v344_v20, 8 }
 0x20a   :  { %v336_v23 = vpop.permute.xlu1 %335 }
 0x20f   :  { %v380_v25 = vpop.permute.xlu1 %379 }
 0x224   :  { %609 = vrot.lane.b32.xlu1 %v3336_v15, %s3246_s2 }
 0x225   :  { %3179 = vset.pattern.permute.xlu1 %v3245_v12 }
 0x228   :  { %653 = vrot.lane.b32.xlu1 %v3336_v15, %s3248_s21 }
 0x22b   :  { %3180 = vset.pattern.permute.xlu0 %v3247_v18 }
 0x22c   :  { %645 = vperm.xlu1 %3179, %v3336_v15  }
 0x27e   :  { %v318_v26 = vpop.trf.xlu0 }
 0x27f   :  { %v341_v27 = vrot.slane %v318_v26, %v3358_v24 }
 0x281   :  { %v3361_v29 = vsub.f32 %v336_v23, %v341_v27  ;;  %v32_v27 = vand.u32 127, %v29_v21 }
 0x282   :  { %v362_v28 = vpop.trf.xlu1 }
 0x283   :  { %v385_v30 = vrot.slane %v362_v28, %v3358_v24  ;;  %v387_v32 = vmul.f32 %v3361_v29, %v3361_v29  ;;  %vm3411_vm8 = vcmp.ge.s32.totalorder %v3355_v22, %v32_v27 }
 0x285   :  { %v386_v31 = vsub.f32 %v380_v25, %v385_v30 }
 0x287   :  { %v388_v33 = vmul.f32 %v386_v31, %v386_v31 }
 0x289   :  { %v3366_v34 = vadd.f32 %v388_v33, %v387_v32 }
 0x28b   :  { %v398_v35 = vsel %vm397_vm3, %v3366_v34, 0.0  ;;  %vm390_vm7 = vcmp.gt.f32.partialorder %v3366_v34, 0.0 }
 0x28c   :  { %399 = vadd.xlane.f32.xlu0 %v398_v35  ;;  %v391_v20 = vsel %vm390_vm7, %v3366_v34, 1.0 }
 0x296   :  { %v610_v36 = vpop.permute.xlu1 %609 }
 0x297   :  { %612 = vxpose.xlu1.b32.start.end [1/1] (short) (narrow) %v610_v36, 8 }
 0x29a   :  { %v654_v37 = vpop.permute.xlu1 %653 }
 0x29b   :  { %656 = vxpose.xlu1.b32.start.end [1/1] (short) (narrow) %v654_v37, 8 }
 0x2a7   :  { %v646_v44 = vpop.permute.xlu1 %645 }
 0x2b9   :  { %222 = vrot.lane.b32.xlu1 %v3338_v17, %s3251_s22 }
 0x313   :  { %v628_v47 = vpop.trf.xlu1 }
 0x314   :  { %v651_v56 = vrot.slane %v628_v47, %v3358_v24 }
 0x315   :  { %v400_v39 = vpop.xlane.xlu0 %399 }
 0x316   :  { %v401_v40 = vrot.slane %v400_v39, 4  ;;  %v3394_v60 = vsub.f32 %v646_v44, %v651_v56 }
 0x317   :  { %v672_v48 = vpop.trf.xlu1 }
 0x318   :  { %v402_v41 = vadd.f32 %v401_v40, %v400_v39  ;;  %v695_v58 = vrot.slane %v672_v48, %v3358_v24  ;;  %v697_v2 = vmul.f32 %v3394_v60, %v3394_v60 }
 0x31a   :  { %v403_v42 = vrot.slane %v402_v41, 2 }
 0x31c   :  { %v404_v43 = vadd.f32 %v403_v42, %v402_v41 }
 0x31e   :  { %v405_v45 = vrot.slane %v404_v43, 1 }
 0x320   :  { %v406_v46 = vadd.f32 %v405_v45, %v404_v43 }
 0x322   :  { %3131 = vpush %v406_v46 }
 0x32b   :  { %v223_v49 = vpop.permute.xlu1 %222 }
 0x32c   :  { %3006 = vmatpush3.xpose.msk.msra.mxu0 %vm139_vm2, %v223_v49 }
 0x32d   :  { %3010 = vmatprep.subr.mxu0 %v3249_v38 }
 0x32f   :  { %3008 = vmatmul.mubr.msk.f32.vlgmr.msra.gmra.mxu0 %vm139_vm2, %v3338_v17 }
 0x330   :  { %3012 = vmatprep.mubr.msk.f32.mxu0 %vm3250_vm4, %v3249_v38 }
 0x353   :  { %s3384_s23 = spop %3131 }
 0x354   :  { %s410_s24 = smul.f32 0.015625, %s3384_s23 }
 0x356   :  { %v411_v50 = vstv %s410_s24 }
 0x357   :  { %v412_v51 = vsub.f32 %v3366_v34, %v411_v50 }
 0x359   :  { %v413_v52 = vmul.f32 %v412_v51, %v412_v51 }
 0x35b   :  { %v414_v53 = vsel %vm397_vm3, %v413_v52, 0.0 }
 0x35c   :  { %415 = vadd.xlane.f32.xlu0 %v414_v53 }
 0x372   :  { %689 = vperm.xlu0 %3180, %v3336_v15  }
 0x3e5   :  { %v416_v54 = vpop.xlane.xlu0 %415 }
 0x3e6   :  { %v417_v55 = vrot.slane %v416_v54, 4 }
 0x3e8   :  { %v418_v57 = vadd.f32 %v417_v55, %v416_v54 }
 0x3ea   :  { %v419_v59 = vrot.slane %v418_v57, 2 }
 0x3ec   :  { %v420_v61 = vadd.f32 %v419_v59, %v418_v57 }
 0x3ed   :  { %v690_v62 = vpop.permute.xlu0 %689 }
 0x3ee   :  { %v696_v63 = vsub.f32 %v690_v62, %v695_v58  ;;  %v421_v0 = vrot.slane %v420_v61, 1 }
 0x3ef   :  { %v294_v1 = vpop.f32.mrf.mxu0 }
 0x3f0   :  { %v698_v3 = vmul.f32 %v696_v63, %v696_v63  ;;  %v422_v4 = vadd.f32 %v421_v0, %v420_v61 }
 0x3f1   :  { %v3009_v5 = vpop.f32.mrf.mxu0 }
 0x3f2   :  { %v3398_v6 = vadd.f32 %v698_v3, %v697_v2  ;;  %3133 = vpush %v422_v4 }
 0x3f4   :  { %v707_v7 = vsel %vm397_vm3, %v3398_v6, 0.0  ;;  %vm700_vm14 = vcmp.gt.f32.partialorder %v3398_v6, 0.0 }
 0x3f5   :  { %708 = vadd.xlane.f32.xlu0 %v707_v7  ;;  %v701_v0 = vsel %vm700_vm14, %v3398_v6, 1.0 }
 0x40b   :  { %532 = vrot.lane.b32.xlu0 %v3336_v15, %s3251_s22 }
 0x423   :  { %s3134_s25 = spop %3133 }
 0x424   :  { %s426_s26 = smul.f32 0.015873017, %s3134_s25 }
 0x426   :  { %v427_v8 = vstv %s426_s26 }
 0x427   :  { %3185 = vrsqrt.f32 %v427_v8  ;;  %vm430_vm5 = vcmp.eq.f32.partialorder %v427_v8, inf  ;;  %v433_v14 = vand.u32 2147483648, %v427_v8  ;;  %vm432_vm6 = vcmp.eq.f32.partialorder %v427_v8, 0.0 }
 0x428   :  { %3187 = vrsqrt.f32 %v391_v20 }
 0x434   :  { %v3186_v9 = vpop.eup %3185 }
 0x435   :  { %v429_v13 = vmul.f32 %v3186_v9, %v427_v8  ;;  %v3188_v23 = vpop.eup %3187 }
 0x436   :  { %v393_v25 = vmul.f32 %v3188_v23, %v3361_v29  ;;  %v298_v29 = vmul.f32 0.17677669, %v294_v1 }
 0x437   :  { %v431_v16 = vsel %vm430_vm5, %v427_v8, %v429_v13 }
 0x438   :  { %v434_v19 = vsel %vm432_vm6, %v433_v14, %v431_v16  ;;  %v394_v26 = vsel %vm390_vm7, %v393_v25, 1.0 }
 0x439   :  { %3135 = vpush %v434_v19  ;;  %v395_v28 = vadd.f32 1.0, %v394_v26 }
 0x43b   :  { %v396_v32 = vmul.f32 0.5, %v395_v28 }
 0x46a   :  { %s3136_s27 = spop %3135 }
 0x46b   :  { %s436_s28 = smul.f32 1.25, %s3136_s27 }
 0x46d   :  { %s437_s29 = sadd.f32 %s436_s28, %s410_s24 }
 0x46f   :  { %v438_v31 = vstv %s437_s29 }
 0x470   :  { %vm439_vm9 = vcmp.le.f32.partialorder %v3366_v34, %v438_v31  ;;  %v931_v31 = vmul.f32 %v3338_v17, %v3338_v17 }
 0x471   :  { %vm440_vm10 = vmand %vm439_vm9, %vm3411_vm8 }
 0x472   :  { %v441_v33 = vsel %vm440_vm10, %v396_v32, 0.0  ;;  %v932_v32 = vmul.f32 %v3336_v15, %v3336_v15 }
 0x473   :  { %vm442_vm11 = vcmp.eq.f32.partialorder %v441_v33, 0.0 }
 0x474   :  { %v443_v21 = vsel %vm442_vm11, -1e+30, %v298_v29 }
 0x475   :  { %v444_v35 = vsel %vm397_vm3, %v443_v21, -inf }
 0x476   :  { %445 = vmax.xlane.f32.xlu0 %v444_v35 }
 0x47e   :  { %v709_v36 = vpop.xlane.xlu0 %708 }
 0x47f   :  { %v710_v37 = vrot.slane %v709_v36, 4 }
 0x481   :  { %v711_v39 = vadd.f32 %v710_v37, %v709_v36 }
 0x482   :  { %v533_v40 = vpop.permute.xlu0 %532 }
 0x483   :  { %v712_v41 = vrot.slane %v711_v39, 2  ;;  %3016 = vmatpush3.xpose.msk.msra.mxu1 %vm139_vm2, %v533_v40 }
 0x485   :  { %v713_v42 = vadd.f32 %v712_v41, %v711_v39 }
 0x486   :  { %3018 = vmatmul.mubr.msk.f32.vlgmr.msra.gmra.mxu1 %vm139_vm2, %v3336_v15 }
 0x487   :  { %v714_v34 = vrot.slane %v713_v42, 1 }
 0x489   :  { %v715_v43 = vadd.f32 %v714_v34, %v713_v42 }
 0x48b   :  { %3137 = vpush %v715_v43 }
 0x48c   :  { %764 = vrot.lane.b32.xlu0 %v3336_v15, %s3252_s30 }
 0x4bc   :  { %s3424_s9 = spop %3137 }
 0x4bd   :  { %s719_s10 = smul.f32 0.015625, %s3424_s9 }
 0x4bf   :  { %v720_v44 = vstv %s719_s10 }
 0x4c0   :  { %v721_v45 = vsub.f32 %v3398_v6, %v720_v44 }
 0x4c2   :  { %v722_v46 = vmul.f32 %v721_v45, %v721_v45 }
 0x4c4   :  { %v723_v47 = vsel %vm397_vm3, %v722_v46, 0.0 }
 0x4c5   :  { %724 = vadd.xlane.f32.xlu1 %v723_v47 }
 0x4ff   :  { %v446_v1 = vpop.xlane.xlu0 %445 }
 0x500   :  { %v447_v2 = vsub.f32 %v443_v21, %v446_v1  ;;  %v3492_v1 = vsub.s32 1, %v3355_v22 }
 0x502   :  { %v448_v4 = vmul.f32 1.442695, %v447_v2 }
 0x503   :  { %v765_v37 = vpop.permute.xlu0 %764 }
 0x546   :  { %v604_v48 = vpop.f32.mrf.mxu1 }
 0x547   :  { %v608_v14 = vmul.f32 0.17677669, %v604_v48 }
 0x548   :  { %v3019_v49 = vpop.f32.mrf.mxu1 }
 0x54e   :  { %v725_v50 = vpop.xlane.xlu1 %724 }
 0x54f   :  { %v726_v51 = vrot.slane %v725_v50, 4 }
 0x551   :  { %v727_v52 = vadd.f32 %v726_v51, %v725_v50  ;;  %v843_v50 = vld [vmem:[%s3839_s4 + $0x18] sm:$0xff]  ;;  %v842_v51 = vld [vmem:[%s3839_s4 + $0x10] sm:$0xff] }
 0x552   :  { %3025 = vmatprep.subr.mxu1 %v843_v50 }
 0x553   :  { %v728_v53 = vrot.slane %v727_v52, 2  ;;  %3026 = vmatpush3.msra.mxu1 %v843_v50 }
 0x554   :  { %3027 = vmatprep.subr.mxu1 %v842_v51 }
 0x555   :  { %v729_v54 = vadd.f32 %v728_v53, %v727_v52  ;;  %v841_v52 = vld [vmem:[%s3839_s4 + $0x8] sm:$0xff]  ;;  %3028 = vmatpush3.msra.mxu1 %v842_v51  ;;  %v840_v53 = vld [vmem:[%s3839_s4] sm:$0xff] }
 0x556   :  { %3029 = vmatprep.subr.mxu1 %v841_v52 }
 0x557   :  { %v730_v55 = vrot.slane %v729_v54, 1  ;;  %3030 = vmatpush3.msra.mxu1 %v841_v52 }
 0x558   :  { %3031 = vmatprep.subr.mxu1 %v840_v53 }
 0x559   :  { %v731_v56 = vadd.f32 %v730_v55, %v729_v54  ;;  %3032 = vmatpush3.msra.mxu1 %v840_v53 }
 0x55a   :  { %3047 = vmatprep.subr.mxu1 %v3249_v38 }
 0x55b   :  { %3139 = vpush %v731_v56 }
 0x58c   :  { %s3140_s11 = spop %3139 }
 0x58d   :  { %s735_s12 = smul.f32 0.015873017, %s3140_s11 }
 0x58f   :  { %v736_v57 = vstv %s735_s12 }
 0x590   :  { %3189 = vrsqrt.f32 %v736_v57  ;;  %vm739_vm12 = vcmp.eq.f32.partialorder %v736_v57, inf  ;;  %v742_v61 = vand.u32 2147483648, %v736_v57  ;;  %vm741_vm13 = vcmp.eq.f32.partialorder %v736_v57, 0.0 }
 0x591   :  { %3191 = vrsqrt.f32 %v701_v0  ;;  %v2871_v0 = vld [vmem:[%s3837_s3 + $0x28] sm:$0xff] }
 0x592   :  { %3193 = vpow2.f32 %v448_v4  ;;  %v930_v4 = vld [vmem:[%s3840_s5] sm:$0x7] }
 0x59d   :  { %v3190_v58 = vpop.eup %3189 }
 0x59e   :  { %v738_v59 = vmul.f32 %v3190_v58, %v736_v57  ;;  %v3192_v3 = vpop.eup %3191 }
 0x59f   :  { %v703_v5 = vmul.f32 %v3192_v3, %v3394_v60  ;;  %v3194_v20 = vpop.eup %3193 }
 0x5a0   :  { %v740_v62 = vsel %vm739_vm12, %v736_v57, %v738_v59  ;;  %v450_v23 = vsel %vm397_vm3, %v3194_v20, 0.0 }
 0x5a1   :  { %v743_v63 = vsel %vm741_vm13, %v742_v61, %v740_v62  ;;  %v704_v7 = vsel %vm700_vm14, %v703_v5, 1.0  ;;  %v988_v5 = vrot.slane %v930_v4, %v3492_v1 }
 0x5a2   :  { %3141 = vpush %v743_v63  ;;  %v705_v8 = vadd.f32 1.0, %v704_v7  ;;  %v2872_v63 = vld [vmem:[%s3837_s3 + $0x30] sm:$0xff]  ;;  %v972_v7 = vrot.slane %v930_v4, %v3358_v24 }
 0x5a4   :  { %v706_v13 = vmul.f32 0.5, %v705_v8 }
 0x5d3   :  { %s3142_s13 = spop %3141 }
 0x5d4   :  { %s745_s1 = smul.f32 1.25, %s3142_s13 }
 0x5d6   :  { %s746_s14 = sadd.f32 %s745_s1, %s719_s10 }
 0x5d8   :  { %v747_v9 = vstv %s746_s14 }
 0x5d9   :  { %vm748_vm15 = vcmp.le.f32.partialorder %v3398_v6, %v747_v9 }
 0x5da   :  { %vm749_vm0 = vmand %vm748_vm15, %vm3411_vm8 }
 0x5db   :  { %v750_v16 = vsel %vm749_vm0, %v706_v13, 0.0  ;;  %v3500_v13 = vsub.s32 2, %v3355_v22 }
 0x5dc   :  { %vm751_vm1 = vcmp.eq.f32.partialorder %v750_v16, 0.0 }
 0x5dd   :  { %v752_v19 = vsel %vm751_vm1, -1e+30, %v608_v14 }
 0x5de   :  { %v753_v60 = vsel %vm397_vm3, %v752_v19, -inf }
 0x5df   :  { %754 = vmax.xlane.f32.xlu1 %v753_v60 }
 0x5e3   :  { %451 = vadd.xlane.f32.xlu1 %v450_v23 }
 0x668   :  { %v755_v25 = vpop.xlane.xlu1 %754 }
 0x669   :  { %v756_v26 = vsub.f32 %v752_v19, %v755_v25 }
 0x66b   :  { %v757_v27 = vmul.f32 1.442695, %v756_v26  ;;  %v2868_v26 = vld [vmem:[%s3839_s4 + $0x20] ss:$0 sm:$0xff] }
 0x66c   :  { %v452_v29 = vpop.xlane.xlu1 %451 }
 0x66d   :  { %3195 = vpow2.f32 %v757_v27 }
 0x66e   :  { %3197 = vrcp.f32 %v452_v29 }
 0x67a   :  { %v3196_v6 = vpop.eup %3195 }
 0x67b   :  { %v759_v28 = vsel %vm397_vm3, %v3196_v6, 0.0  ;;  %v3198_v21 = vpop.eup %3197 }
 0x67c   :  { %760 = vadd.xlane.f32.xlu1 %v759_v28  ;;  %v454_v36 = vmul.f32 %v3198_v21, %v3194_v20  ;;  %v996_v20 = vrot.slane %v930_v4, %v3500_v13 }
 0x68d   :  { %455 = vrot.lane.b32.xlu1 %v3338_v17, %s3252_s30 }
 0x691   :  { %935 = vrot.lane.b32.xlu1 %v931_v31, %s3253_s15 }
 0x695   :  { %937 = vrot.lane.b32.xlu1 %v932_v32, %s3253_s15 }
 0x705   :  { %v761_v33 = vpop.xlane.xlu1 %760 }
 0x706   :  { %3199 = vrcp.f32 %v761_v33 }
 0x709   :  { %v456_v35 = vpop.permute.xlu1 %455 }
 0x70a   :  { %3011 = vmatpush3.msra.mxu0 %v456_v35 }
 0x70b   :  { %3013 = vmatmul.mubr.msk.f32.vlgmr.msra.gmra.mxu0 %vm397_vm3, %v454_v36  ;;  %3020 = vmatprep.subr.mxu0 %v3249_v38 }
 0x70c   :  { %3021 = vmatpush3.msra.mxu0 %v765_v37  ;;  %3022 = vmatprep.mubr.msk.f32.mxu0 %vm3250_vm4, %v3249_v38 }
 0x70d   :  { %v936_v39 = vpop.permute.xlu1 %935 }
 0x70e   :  { %v941_v40 = vadd.f32 %v936_v39, %v931_v31 }
 0x710   :  { %v943_v41 = vmax.f32 %v941_v40, 1e-24 }
 0x711   :  { %v938_v42 = vpop.permute.xlu1 %937 }
 0x712   :  { %3201 = vrsqrt.f32 %v943_v41  ;;  %v942_v34 = vadd.f32 %v938_v42, %v932_v32 }
 0x713   :  { %v3200_v43 = vpop.eup %3199 }
 0x714   :  { %v944_v44 = vmax.f32 %v942_v34, 1e-24  ;;  %v763_v45 = vmul.f32 %v3200_v43, %v3196_v6 }
 0x716   :  { %3203 = vrsqrt.f32 %v944_v44  ;;  %3023 = vmatmul.mubr.msk.f32.vlgmr.msra.gmra.mxu0 %vm397_vm3, %v763_v45 }
 0x71f   :  { %v3202_v46 = vpop.eup %3201 }
 0x720   :  { %951 = vrot.lane.b32.xlu1 %v3202_v46, %s3254_s0  ;;  %v947_v47 = vmul.f32 %v3202_v46, %v3338_v17 }
 0x723   :  { %v3204_v48 = vpop.eup %3203 }
 0x724   :  { %961 = vperm.xlu1 %3179, %v947_v47   ;;  %953 = vrot.lane.b32.xlu0 %v3204_v48, %s3254_s0  ;;  %v948_v49 = vmul.f32 %v3204_v48, %v3336_v15 }
 0x728   :  { %966 = vperm.xlu1 %3179, %v948_v49  }
 0x792   :  { %v952_v54 = vpop.permute.xlu1 %951 }
 0x793   :  { %v957_v55 = vmul.f32 %v952_v54, %v3338_v17  ;;  %v2874_v17 = vld [vmem:[%s3837_s3 + $0x40] sm:$0xff] }
 0x794   :  { %3036 = vmatprep.subr.mxu0 %v2874_v17 }
 0x795   :  { %977 = vperm.xlu0 %3180, %v957_v55   ;;  %3037 = vmatpush3.msra.mxu0 %v2874_v17 }
 0x796   :  { %v954_v56 = vpop.permute.xlu0 %953 }
 0x797   :  { %v958_v57 = vmul.f32 %v954_v56, %v3336_v15  ;;  %v2873_v15 = vld [vmem:[%s3837_s3 + $0x38] sm:$0xff] }
 0x798   :  { %3038 = vmatprep.subr.mxu0 %v2873_v15 }
 0x799   :  { %982 = vperm.xlu0 %3180, %v958_v57   ;;  %3039 = vmatpush3.msra.mxu0 %v2873_v15 }
 0x79a   :  { %3040 = vmatprep.subr.mxu0 %v2872_v63 }
 0x79b   :  { %3041 = vmatpush3.msra.mxu0 %v2872_v63 }
 0x79c   :  { %3042 = vmatprep.subr.mxu0 %v2871_v0 }
 0x79d   :  { %3043 = vmatpush3.msra.mxu0 %v2871_v0 }
 0x79e   :  { %3052 = vmatprep.subr.mxu0 %v3249_v38 }
 0x79f   :  { %v962_v3 = vpop.permute.xlu1 %961 }
 0x7a0   :  { %v973_v19 = vmul.f32 %v972_v7, %v962_v3 }
 0x7a3   :  { %v967_v9 = vpop.permute.xlu1 %966 }
 0x7a4   :  { %v974_v60 = vmul.f32 %v972_v7, %v967_v9 }
 0x7cb   :  { %v527_v58 = vpop.f32.mrf.mxu0 }
 0x7cc   :  { %3033 = vmatprep.mubr.msk.f32.mxu1 %vm139_vm2, %v527_v58 }
 0x7cd   :  { %v3014_v59 = vpop.f32.mrf.mxu0 }
 0x7d6   :  { %v836_v61 = vpop.f32.mrf.mxu0 }
 0x7d7   :  { %3034 = vmatmul.mubr.msk.f32.vlgmr.msra.gmra.mxu1 %vm139_vm2, %v836_v61 }
 0x7d8   :  { %v3024_v62 = vpop.f32.mrf.mxu0  ;;  %3049 = vmatprep.mubr.msk.f32.mxu1 %vm3250_vm4, %v3249_v38 }
 0x810   :  { %v978_v2 = vpop.permute.xlu0 %977 }
 0x811   :  { %v989_v14 = vmul.f32 %v988_v5, %v978_v2 }
 0x813   :  { %v991_v23 = vadd.f32 %v989_v14, %v973_v19 }
 0x814   :  { %v983_v8 = vpop.permute.xlu0 %982 }
 0x815   :  { %v990_v16 = vmul.f32 %v988_v5, %v983_v8  ;;  %v997_v6 = vadd.f32 %v996_v20, %v991_v23 }
 0x817   :  { %v992_v25 = vadd.f32 %v990_v16, %v974_v60  ;;  %v1001_v33 = vmul.f32 0.1, %v997_v6 }
 0x819   :  { %v998_v31 = vadd.f32 %v996_v20, %v992_v25 }
 0x81b   :  { %v1002_v35 = vmul.f32 0.1, %v998_v31 }
 0x897   :  { %v3035_v27 = vpop.f32.mrf.mxu1 }
 0x898   :  { %v927_v28 = vadd.f32 %v3035_v27, %v2868_v26 }
 0x899   :  { %v921_v32 = vpop.f32.mrf.mxu1 }
 0x89a   :  { %v922_v29 = vadd.f32 %v2868_v26, %v921_v32  ;;  %v1000_v22 = vadd.f32 %v927_v28, %v3326_v11  ;;  %v2876_v11 = vld [vmem:[%s3837_s3 + $0x48] ss:$0 sm:$0xff] }
 0x89c   :  { %v999_v21 = vadd.f32 %v922_v29, %v3324_v10  ;;  %v3510_v37 = vadd.f32 %v1002_v35, %v1000_v22 }
 0x89e   :  { %v3508_v36 = vadd.f32 %v1001_v33, %v999_v21 }
 0x8a0   :  { %3044 = vmatprep.mubr.msk.f32.mxu0 %vm139_vm2, %v3508_v36 }
 0x8a1   :  { %3045 = vmatmul.mubr.msk.f32.vlgmr.msra.gmra.mxu0 %vm139_vm2, %v3510_v37 }
 0x8a2   :  { %3054 = vmatprep.mubr.msk.f32.mxu0 %vm3250_vm4, %v3249_v38 }
 0x961   :  { %v3046_v39 = vpop.f32.mrf.mxu0 }
 0x962   :  { %v3521_v10 = vadd.f32 %v3046_v39, %v2876_v11 }
 0x963   :  { %v1087_v40 = vpop.f32.mrf.mxu0 }
 0x964   :  { %v3523_v41 = vadd.f32 %v2876_v11, %v1087_v40 }
 0x966   :  { %1218 = vrot.lane.b32.xlu0 %v3523_v41, %s3248_s21  ;;  %1174 = vrot.lane.b32.xlu1 %v3523_v41, %s3246_s2 }
 0x96a   :  { %1254 = vperm.xlu0 %3180, %v3523_v41   ;;  %1210 = vperm.xlu1 %3179, %v3523_v41  }
 0x9d8   :  { %v1219_v42 = vpop.permute.xlu0 %1218  ;;  %v1175_v34 = vpop.permute.xlu1 %1174 }
 0x9d9   :  { %1221 = vxpose.xlu0.b32.start.end [1/1] (short) (narrow) %v1219_v42, 8  ;;  %1177 = vxpose.xlu1.b32.start.end [1/1] (short) (narrow) %v1175_v34, 8 }
 0x9e5   :  { %v1255_v43 = vpop.permute.xlu0 %1254  ;;  %v1211_v44 = vpop.permute.xlu1 %1210 }
 0x9f7   :  { %1483 = vrot.lane.b32.xlu1 %v3521_v10, %s3246_s2 }
 0x9f8   :  { %3182 = vset.pattern.permute.xlu1 %v3247_v18 }
 0x9fb   :  { %1527 = vrot.lane.b32.xlu1 %v3521_v10, %s3248_s21 }
 0x9ff   :  { %1563 = vperm.xlu1 %3182, %v3521_v10  }
 0xa02   :  { %3181 = vset.pattern.permute.xlu0 %v3245_v12 }
 0xa55   :  { %v1237_v45 = vpop.trf.xlu0  ;;  %v1193_v46 = vpop.trf.xlu1 }
 0xa56   :  { %v1260_v47 = vrot.slane %v1237_v45, %v3358_v24  ;;  %v1216_v48 = vrot.slane %v1193_v46, %v3358_v24 }
 0xa58   :  { %v1261_v49 = vsub.f32 %v1255_v43, %v1260_v47  ;;  %v3540_v50 = vsub.f32 %v1211_v44, %v1216_v48 }
 0xa5a   :  { %v1263_v51 = vmul.f32 %v1261_v49, %v1261_v49  ;;  %v1262_v52 = vmul.f32 %v3540_v50, %v3540_v50 }
 0xa5c   :  { %v3544_v53 = vadd.f32 %v1263_v51, %v1262_v52 }
 0xa5e   :  { %v1272_v54 = vsel %vm397_vm3, %v3544_v53, 0.0  ;;  %vm1265_vm7 = vcmp.gt.f32.partialorder %v3544_v53, 0.0 }
 0xa5f   :  { %1273 = vadd.xlane.f32.xlu0 %v1272_v54  ;;  %v1266_v49 = vsel %vm1265_vm7, %v3544_v53, 1.0 }
 0xa69   :  { %v1484_v55 = vpop.permute.xlu1 %1483 }
 0xa6d   :  { %v1528_v3 = vpop.permute.xlu1 %1527 }
 0xa75   :  { %1519 = vperm.xlu0 %3181, %v3521_v10  }
 0xa7a   :  { %v1564_v4 = vpop.permute.xlu1 %1563 }
 0xa93   :  { %1486 = vxpose.xlu0.b32.start.end [1/1] (short) (narrow) %v1484_v55, 8 }
 0xae8   :  { %v1274_v56 = vpop.xlane.xlu0 %1273 }
 0xae9   :  { %v1275_v57 = vrot.slane %v1274_v56, 4 }
 0xaeb   :  { %v1276_v58 = vadd.f32 %v1275_v57, %v1274_v56 }
 0xaed   :  { %v1277_v59 = vrot.slane %v1276_v58, 2 }
 0xaef   :  { %v1278_v61 = vadd.f32 %v1277_v59, %v1276_v58 }
 0xaf0   :  { %v1520_v60 = vpop.permute.xlu0 %1519 }
 0xaf1   :  { %v1279_v62 = vrot.slane %v1278_v61, 1 }
 0xaf3   :  { %v1280_v17 = vadd.f32 %v1279_v62, %v1278_v61 }
 0xaf5   :  { %3143 = vpush %v1280_v17 }
 0xb0f   :  { %v1502_v20 = vpop.trf.xlu0 }
 0xb10   :  { %v1525_v23 = vrot.slane %v1502_v20, %v3358_v24 }
 0xb12   :  { %v3559_v26 = vsub.f32 %v1520_v60, %v1525_v23 }
 0xb14   :  { %v1571_v28 = vmul.f32 %v3559_v26, %v3559_v26 }
 0xb26   :  { %s3549_s19 = spop %3143 }
 0xb27   :  { %s1284_s20 = smul.f32 0.015625, %s3549_s19 }
 0xb29   :  { %v1285_v15 = vstv %s1284_s20 }
 0xb2a   :  { %v1286_v63 = vsub.f32 %v3544_v53, %v1285_v15 }
 0xb2c   :  { %v1287_v0 = vmul.f32 %v1286_v63, %v1286_v63 }
 0xb2e   :  { %v1288_v2 = vsel %vm397_vm3, %v1287_v0, 0.0 }
 0xb2f   :  { %1289 = vadd.xlane.f32.xlu1 %v1288_v2 }
 0xb62   :  { %1530 = vxpose.xlu1.b32.start.end [1/1] (short) (narrow) %v1528_v3, 8 }
 0xb80   :  { %1097 = vrot.lane.b32.xlu1 %v3523_v41, %s3251_s22 }
 0xbb8   :  { %v1290_v5 = vpop.xlane.xlu1 %1289 }
 0xbb9   :  { %v1291_v7 = vrot.slane %v1290_v5, 4 }
 0xbbb   :  { %v1292_v8 = vadd.f32 %v1291_v7, %v1290_v5 }
 0xbbd   :  { %v1293_v9 = vrot.slane %v1292_v8, 2 }
 0xbbf   :  { %v1294_v14 = vadd.f32 %v1293_v9, %v1292_v8 }
 0xbc1   :  { %v1295_v16 = vrot.slane %v1294_v14, 1 }
 0xbc3   :  { %v1296_v19 = vadd.f32 %v1295_v16, %v1294_v14 }
 0xbc5   :  { %3145 = vpush %v1296_v19 }
 0xbde   :  { %v1546_v25 = vpop.trf.xlu1 }
 0xbdf   :  { %v1569_v27 = vrot.slane %v1546_v25, %v3358_v24 }
 0xbe1   :  { %v1570_v6 = vsub.f32 %v1564_v4, %v1569_v27 }
 0xbe3   :  { %v1572_v31 = vmul.f32 %v1570_v6, %v1570_v6 }
 0xbe5   :  { %v3564_v32 = vadd.f32 %v1572_v31, %v1571_v28 }
 0xbe7   :  { %v1581_v29 = vsel %vm397_vm3, %v3564_v32, 0.0  ;;  %vm1574_vm14 = vcmp.gt.f32.partialorder %v3564_v32, 0.0 }
 0xbe8   :  { %1582 = vadd.xlane.f32.xlu0 %v1581_v29  ;;  %v1575_v6 = vsel %vm1574_vm14, %v3564_v32, 1.0 }
 0xbf2   :  { %v1098_v22 = vpop.permute.xlu1 %1097 }
 0xbf3   :  { %3048 = vmatpush3.xpose.msk.msra.mxu1 %vm139_vm2, %v1098_v22 }
 0xbf4   :  { %3057 = vmatprep.subr.mxu1 %v3249_v38 }
 0xbf6   :  { %3050 = vmatmul.mubr.msk.f32.vlgmr.msra.gmra.mxu1 %vm139_vm2, %v3523_v41  ;;  %s3146_s23 = spop %3145 }
 0xbf7   :  { %s1300_s24 = smul.f32 0.015873017, %s3146_s23  ;;  %3059 = vmatprep.mubr.msk.f32.mxu1 %vm3250_vm4, %v3249_v38 }
 0xbf9   :  { %v1301_v33 = vstv %s1300_s24 }
 0xbfa   :  { %3205 = vrsqrt.f32 %v1301_v33  ;;  %vm1304_vm5 = vcmp.eq.f32.partialorder %v1301_v33, inf  ;;  %v1307_v11 = vand.u32 2147483648, %v1301_v33  ;;  %vm1306_vm6 = vcmp.eq.f32.partialorder %v1301_v33, 0.0 }
 0xbfb   :  { %3207 = vrsqrt.f32 %v1266_v49  ;;  %v1807_v49 = vmul.f32 %v3523_v41, %v3523_v41 }
 0xbfe   :  { %1406 = vrot.lane.b32.xlu0 %v3521_v10, %s3251_s22 }
 0xc07   :  { %v3206_v21 = vpop.eup %3205 }
 0xc08   :  { %v1303_v35 = vmul.f32 %v3206_v21, %v1301_v33  ;;  %v3208_v51 = vpop.eup %3207 }
 0xc09   :  { %v1268_v52 = vmul.f32 %v3208_v51, %v3540_v50  ;;  %v1808_v51 = vmul.f32 %v3521_v10, %v3521_v10 }
 0xc0a   :  { %v1305_v39 = vsel %vm1304_vm5, %v1301_v33, %v1303_v35 }
 0xc0b   :  { %v1308_v40 = vsel %vm1306_vm6, %v1307_v11, %v1305_v39  ;;  %v1269_v55 = vsel %vm1265_vm7, %v1268_v52, 1.0 }
 0xc0c   :  { %3147 = vpush %v1308_v40  ;;  %v1270_v56 = vadd.f32 1.0, %v1269_v55 }
 0xc0e   :  { %v1271_v50 = vmul.f32 0.5, %v1270_v56 }
 0xc3d   :  { %s3148_s25 = spop %3147 }
 0xc3e   :  { %s1310_s26 = smul.f32 1.25, %s3148_s25 }
 0xc40   :  { %s1311_s27 = sadd.f32 %s1310_s26, %s1284_s20 }
 0xc42   :  { %v1312_v54 = vstv %s1311_s27 }
 0xc43   :  { %vm1313_vm9 = vcmp.le.f32.partialorder %v3544_v53, %v1312_v54 }
 0xc44   :  { %vm1314_vm10 = vmand %vm1313_vm9, %vm3411_vm8 }
 0xc45   :  { %v1315_v61 = vsel %vm1314_vm10, %v1271_v50, 0.0 }
 0xc46   :  { %vm1316_vm11 = vcmp.eq.f32.partialorder %v1315_v61, 0.0 }
 0xc71   :  { %v1583_v42 = vpop.xlane.xlu0 %1582 }
 0xc72   :  { %v1584_v34 = vrot.slane %v1583_v42, 4 }
 0xc74   :  { %v1585_v43 = vadd.f32 %v1584_v34, %v1583_v42 }
 0xc75   :  { %v1407_v44 = vpop.permute.xlu0 %1406 }
 0xc76   :  { %v1586_v45 = vrot.slane %v1585_v43, 2  ;;  %3058 = vmatpush3.xpose.msk.msra.mxu1 %vm139_vm2, %v1407_v44 }
 0xc78   :  { %v1587_v46 = vadd.f32 %v1586_v45, %v1585_v43 }
 0xc79   :  { %3060 = vmatmul.mubr.msk.f32.vlgmr.msra.gmra.mxu1 %vm139_vm2, %v3521_v10 }
 0xc7a   :  { %v1588_v47 = vrot.slane %v1587_v46, 1 }
 0xc7c   :  { %v1589_v48 = vadd.f32 %v1588_v47, %v1587_v46 }
 0xc7e   :  { %3149 = vpush %v1589_v48 }
 0xcaf   :  { %s3585_s28 = spop %3149 }
 0xcb0   :  { %s1593_s29 = smul.f32 0.015625, %s3585_s28 }
 0xcb2   :  { %v1594_v57 = vstv %s1593_s29 }
 0xcb3   :  { %v1595_v58 = vsub.f32 %v3564_v32, %v1594_v57 }
 0xcb5   :  { %v1596_v59 = vmul.f32 %v1595_v58, %v1595_v58 }
 0xcb6   :  { %v1169_v62 = vpop.f32.mrf.mxu1 }
 0xcb7   :  { %v1173_v17 = vmul.f32 0.17677669, %v1169_v62  ;;  %v1597_v53 = vsel %vm397_vm3, %v1596_v59, 0.0 }
 0xcb8   :  { %1598 = vadd.xlane.f32.xlu1 %v1597_v53  ;;  %v3051_v15 = vpop.f32.mrf.mxu1 }
 0xcb9   :  { %v1317_v63 = vsel %vm1316_vm11, -1e+30, %v1173_v17 }
 0xcba   :  { %v1318_v0 = vsel %vm397_vm3, %v1317_v63, -inf }
 0xcbb   :  { %1319 = vmax.xlane.f32.xlu0 %v1318_v0 }
 0xcd1   :  { %1638 = vrot.lane.b32.xlu0 %v3521_v10, %s3252_s30 }
 0xd39   :  { %v1478_v2 = vpop.f32.mrf.mxu1 }
 0xd3a   :  { %v1482_v40 = vmul.f32 0.17677669, %v1478_v2 }
 0xd3b   :  { %v3061_v3 = vpop.f32.mrf.mxu1 }
 0xd41   :  { %v1599_v4 = vpop.xlane.xlu1 %1598 }
 0xd42   :  { %v1600_v5 = vrot.slane %v1599_v4, 4 }
 0xd44   :  { %v1601_v7 = vadd.f32 %v1600_v5, %v1599_v4  ;;  %v1320_v28 = vpop.xlane.xlu0 %1319  ;;  %v2888_v5 = vld [vmem:[%s3839_s4 + $0x40] sm:$0xff] }
 0xd45   :  { %v1321_v31 = vsub.f32 %v1317_v63, %v1320_v28  ;;  %3067 = vmatprep.subr.mxu1 %v2888_v5  ;;  %v2894_v28 = vld [vmem:[%s3837_s3 + $0x50] sm:$0xff] }
 0xd46   :  { %v1602_v8 = vrot.slane %v1601_v7, 2  ;;  %3068 = vmatpush3.msra.mxu1 %v2888_v5 }
 0xd47   :  { %v1322_v22 = vmul.f32 1.442695, %v1321_v31 }
 0xd48   :  { %v1603_v9 = vadd.f32 %v1602_v8, %v1601_v7  ;;  %v1639_v58 = vpop.permute.xlu0 %1638  ;;  %v2887_v7 = vld [vmem:[%s3839_s4 + $0x38] sm:$0xff]  ;;  %v2886_v8 = vld [vmem:[%s3839_s4 + $0x30] sm:$0xff] }
 0xd49   :  { %3069 = vmatprep.subr.mxu1 %v2887_v7 }
 0xd4a   :  { %v1604_v14 = vrot.slane %v1603_v9, 1  ;;  %3070 = vmatpush3.msra.mxu1 %v2887_v7 }
 0xd4b   :  { %3071 = vmatprep.subr.mxu1 %v2886_v8 }
 0xd4c   :  { %v1605_v16 = vadd.f32 %v1604_v14, %v1603_v9  ;;  %v2885_v9 = vld [vmem:[%s3839_s4 + $0x28] sm:$0xff]  ;;  %3072 = vmatpush3.msra.mxu1 %v2886_v8 }
 0xd4d   :  { %3073 = vmatprep.subr.mxu1 %v2885_v9 }
 0xd4e   :  { %3151 = vpush %v1605_v16  ;;  %3074 = vmatpush3.msra.mxu1 %v2885_v9 }
 0xd4f   :  { %3089 = vmatprep.subr.mxu1 %v3249_v38 }
 0xd7f   :  { %s3152_s9 = spop %3151 }
 0xd80   :  { %s1609_s10 = smul.f32 0.015873017, %s3152_s9 }
 0xd82   :  { %v1610_v19 = vstv %s1609_s10 }
 0xd83   :  { %3209 = vrsqrt.f32 %v1610_v19  ;;  %vm1613_vm12 = vcmp.eq.f32.partialorder %v1610_v19, inf  ;;  %v1616_v23 = vand.u32 2147483648, %v1610_v19  ;;  %vm1615_vm13 = vcmp.eq.f32.partialorder %v1610_v19, 0.0 }
 0xd84   :  { %3211 = vrsqrt.f32 %v1575_v6  ;;  %v2895_v6 = vld [vmem:[%s3837_s3 + $0x58] sm:$0xff] }
 0xd85   :  { %3213 = vpow2.f32 %v1322_v22  ;;  %v2893_v22 = vld [vmem:[%s3840_s5 + $0x4] sm:$0x7] }
 0xd90   :  { %v3210_v60 = vpop.eup %3209 }
 0xd91   :  { %v1612_v20 = vmul.f32 %v3210_v60, %v1610_v19  ;;  %v3212_v29 = vpop.eup %3211 }
 0xd92   :  { %v1577_v33 = vmul.f32 %v3212_v29, %v3559_v26  ;;  %v3214_v43 = vpop.eup %3213 }
 0xd93   :  { %v1614_v25 = vsel %vm1613_vm12, %v1610_v19, %v1612_v20  ;;  %v1324_v44 = vsel %vm397_vm3, %v3214_v43, 0.0 }
 0xd94   :  { %v1617_v27 = vsel %vm1615_vm13, %v1616_v23, %v1614_v25  ;;  %v1578_v21 = vsel %vm1574_vm14, %v1577_v33, 1.0  ;;  %v1864_v33 = vrot.slane %v2893_v22, %v3492_v1 }
 0xd95   :  { %3153 = vpush %v1617_v27  ;;  %v1579_v35 = vadd.f32 1.0, %v1578_v21  ;;  %v1848_v21 = vrot.slane %v2893_v22, %v3358_v24 }
 0xd97   :  { %v1580_v39 = vmul.f32 0.5, %v1579_v35 }
 0xdc6   :  { %s3154_s11 = spop %3153 }
 0xdc7   :  { %s1619_s12 = smul.f32 1.25, %s3154_s11 }
 0xdc9   :  { %s1620_s13 = sadd.f32 %s1619_s12, %s1593_s29 }
 0xdcb   :  { %v1621_v11 = vstv %s1620_s13 }
 0xdcc   :  { %vm1622_vm15 = vcmp.le.f32.partialorder %v3564_v32, %v1621_v11 }
 0xdcd   :  { %vm1623_vm0 = vmand %vm1622_vm15, %vm3411_vm8 }
 0xdce   :  { %v1624_v42 = vsel %vm1623_vm0, %v1580_v39, 0.0 }
 0xdcf   :  { %vm1625_vm1 = vcmp.eq.f32.partialorder %v1624_v42, 0.0 }
 0xdd0   :  { %v1626_v34 = vsel %vm1625_vm1, -1e+30, %v1482_v40 }
 0xdd1   :  { %v1627_v26 = vsel %vm397_vm3, %v1626_v34, -inf }
 0xdd2   :  { %1628 = vmax.xlane.f32.xlu1 %v1627_v26  ;;  %v1872_v26 = vrot.slane %v2893_v22, %v3500_v13 }
 0xdd6   :  { %1325 = vadd.xlane.f32.xlu1 %v1324_v44 }
 0xe5b   :  { %v1629_v45 = vpop.xlane.xlu1 %1628 }
 0xe5c   :  { %v1630_v46 = vsub.f32 %v1626_v34, %v1629_v45  ;;  %v2890_v45 = vld [vmem:[%s3839_s4 + $0x48] ss:$0 sm:$0xff] }
 0xe5e   :  { %v1631_v47 = vmul.f32 1.442695, %v1630_v46 }
 0xe5f   :  { %v1326_v52 = vpop.xlane.xlu1 %1325 }
 0xe60   :  { %3215 = vpow2.f32 %v1631_v47 }
 0xe61   :  { %3217 = vrcp.f32 %v1326_v52 }
 0xe6d   :  { %v3216_v32 = vpop.eup %3215 }
 0xe6e   :  { %v1633_v48 = vsel %vm397_vm3, %v3216_v32, 0.0  ;;  %v3218_v55 = vpop.eup %3217 }
 0xe6f   :  { %1634 = vadd.xlane.f32.xlu1 %v1633_v48  ;;  %v1328_v57 = vmul.f32 %v3218_v55, %v3214_v43 }
 0xe80   :  { %1329 = vrot.lane.b32.xlu1 %v3523_v41, %s3252_s30 }
 0xe84   :  { %1811 = vrot.lane.b32.xlu1 %v1807_v49, %s3253_s15 }
 0xe88   :  { %1813 = vrot.lane.b32.xlu1 %v1808_v51, %s3253_s15 }
 0xef8   :  { %v1635_v54 = vpop.xlane.xlu1 %1634 }
 0xef9   :  { %3219 = vrcp.f32 %v1635_v54 }
 0xefc   :  { %v1330_v56 = vpop.permute.xlu1 %1329 }
 0xefd   :  { %3053 = vmatpush3.msra.mxu0 %v1330_v56 }
 0xefe   :  { %3055 = vmatmul.mubr.msk.f32.vlgmr.msra.gmra.mxu0 %vm397_vm3, %v1328_v57  ;;  %3062 = vmatprep.subr.mxu0 %v3249_v38 }
 0xeff   :  { %3063 = vmatpush3.msra.mxu0 %v1639_v58  ;;  %3064 = vmatprep.mubr.msk.f32.mxu0 %vm3250_vm4, %v3249_v38 }
 0xf00   :  { %v1812_v50 = vpop.permute.xlu1 %1811 }
 0xf01   :  { %v1817_v59 = vadd.f32 %v1812_v50, %v1807_v49 }
 0xf03   :  { %v1819_v61 = vmax.f32 %v1817_v59, 1e-24 }
 0xf04   :  { %v1814_v62 = vpop.permute.xlu1 %1813 }
 0xf05   :  { %3221 = vrsqrt.f32 %v1819_v61  ;;  %v1818_v17 = vadd.f32 %v1814_v62, %v1808_v51 }
 0xf06   :  { %v3220_v53 = vpop.eup %3219 }
 0xf07   :  { %v1820_v15 = vmax.f32 %v1818_v17, 1e-24  ;;  %v1637_v63 = vmul.f32 %v3220_v53, %v3216_v32 }
 0xf09   :  { %3223 = vrsqrt.f32 %v1820_v15  ;;  %3065 = vmatmul.mubr.msk.f32.vlgmr.msra.gmra.mxu0 %vm397_vm3, %v1637_v63 }
 0xf12   :  { %v3222_v0 = vpop.eup %3221 }
 0xf13   :  { %1827 = vrot.lane.b32.xlu0 %v3222_v0, %s3254_s0  ;;  %v1823_v2 = vmul.f32 %v3222_v0, %v3523_v41 }
 0xf16   :  { %v3224_v3 = vpop.eup %3223 }
 0xf17   :  { %1837 = vperm.xlu0 %3181, %v1823_v2   ;;  %1829 = vrot.lane.b32.xlu1 %v3224_v3, %s3254_s0  ;;  %v1824_v4 = vmul.f32 %v3224_v3, %v3521_v10 }
 0xf1b   :  { %1842 = vperm.xlu0 %3181, %v1824_v4  }
 0xf85   :  { %v1828_v14 = vpop.permute.xlu0 %1827 }
 0xf86   :  { %v1833_v16 = vmul.f32 %v1828_v14, %v3523_v41  ;;  %v2897_v41 = vld [vmem:[%s3837_s3 + $0x68] sm:$0xff] }
 0xf87   :  { %3078 = vmatprep.subr.mxu0 %v2897_v41 }
 0xf88   :  { %1853 = vperm.xlu1 %3182, %v1833_v16   ;;  %3079 = vmatpush3.msra.mxu0 %v2897_v41 }
 0xf89   :  { %v1830_v19 = vpop.permute.xlu1 %1829 }
 0xf8a   :  { %v1834_v60 = vmul.f32 %v1830_v19, %v3521_v10  ;;  %v2896_v10 = vld [vmem:[%s3837_s3 + $0x60] sm:$0xff] }
 0xf8b   :  { %3080 = vmatprep.subr.mxu0 %v2896_v10 }
 0xf8c   :  { %1858 = vperm.xlu1 %3182, %v1834_v60   ;;  %3081 = vmatpush3.msra.mxu0 %v2896_v10 }
 0xf8d   :  { %3082 = vmatprep.subr.mxu0 %v2895_v6 }
 0xf8e   :  { %3083 = vmatpush3.msra.mxu0 %v2895_v6 }
 0xf8f   :  { %3084 = vmatprep.subr.mxu0 %v2894_v28 }
 0xf90   :  { %3085 = vmatpush3.msra.mxu0 %v2894_v28 }
 0xf91   :  { %3094 = vmatprep.subr.mxu0 %v3249_v38 }
 0xf92   :  { %v1838_v29 = vpop.permute.xlu0 %1837 }
 0xf93   :  { %v1849_v42 = vmul.f32 %v1848_v21, %v1838_v29 }
 0xf96   :  { %v1843_v11 = vpop.permute.xlu0 %1842 }
 0xf97   :  { %v1850_v34 = vmul.f32 %v1848_v21, %v1843_v11 }
 0xfbe   :  { %v1401_v20 = vpop.f32.mrf.mxu0 }
 0xfbf   :  { %3075 = vmatprep.mubr.msk.f32.mxu1 %vm139_vm2, %v1401_v20 }
 0xfc0   :  { %v3056_v23 = vpop.f32.mrf.mxu0 }
 0xfc9   :  { %v1710_v25 = vpop.f32.mrf.mxu0 }
 0xfca   :  { %3076 = vmatmul.mubr.msk.f32.vlgmr.msra.gmra.mxu1 %vm139_vm2, %v1710_v25 }
 0xfcb   :  { %v3066_v27 = vpop.f32.mrf.mxu0  ;;  %3091 = vmatprep.mubr.msk.f32.mxu1 %vm3250_vm4, %v3249_v38 }
0x1003   :  { %v1854_v31 = vpop.permute.xlu1 %1853 }
0x1004   :  { %v1865_v39 = vmul.f32 %v1864_v33, %v1854_v31 }
0x1006   :  { %v1867_v43 = vadd.f32 %v1865_v39, %v1849_v42 }
0x1007   :  { %v1859_v35 = vpop.permute.xlu1 %1858 }
0x1008   :  { %v1866_v40 = vmul.f32 %v1864_v33, %v1859_v35  ;;  %v1873_v47 = vadd.f32 %v1872_v26, %v1867_v43 }
0x100a   :  { %v1868_v44 = vadd.f32 %v1866_v40, %v1850_v34  ;;  %v1877_v54 = vmul.f32 0.1, %v1873_v47 }
0x100c   :  { %v1874_v48 = vadd.f32 %v1872_v26, %v1868_v44 }
0x100e   :  { %v1878_v56 = vmul.f32 0.1, %v1874_v48 }
0x108a   :  { %v3077_v46 = vpop.f32.mrf.mxu1 }
0x108b   :  { %v1802_v32 = vadd.f32 %v3077_v46, %v2890_v45 }
0x108c   :  { %v1796_v49 = vpop.f32.mrf.mxu1 }
0x108d   :  { %v1797_v51 = vadd.f32 %v2890_v45, %v1796_v49  ;;  %v1876_v52 = vadd.f32 %v1802_v32, %v3510_v37  ;;  %v2899_v37 = vld [vmem:[%s3837_s3 + $0x70] ss:$0 sm:$0xff] }
0x108f   :  { %v1875_v55 = vadd.f32 %v1797_v51, %v3508_v36  ;;  %v3670_v58 = vadd.f32 %v1878_v56, %v1876_v52 }
0x1091   :  { %v3668_v57 = vadd.f32 %v1877_v54, %v1875_v55 }
0x1093   :  { %3086 = vmatprep.mubr.msk.f32.mxu0 %vm139_vm2, %v3668_v57 }
0x1094   :  { %3087 = vmatmul.mubr.msk.f32.vlgmr.msra.gmra.mxu0 %vm139_vm2, %v3670_v58 }
0x1095   :  { %3096 = vmatprep.mubr.msk.f32.mxu0 %vm3250_vm4, %v3249_v38 }
0x1154   :  { %v3088_v50 = vpop.f32.mrf.mxu0 }
0x1155   :  { %v3681_v36 = vadd.f32 %v3088_v50, %v2899_v37 }
0x1156   :  { %v1963_v59 = vpop.f32.mrf.mxu0 }
0x1157   :  { %v3683_v61 = vadd.f32 %v2899_v37, %v1963_v59 }
0x1159   :  { %2094 = vrot.lane.b32.xlu1 %v3683_v61, %s3248_s21  ;;  %2050 = vrot.lane.b32.xlu0 %v3683_v61, %s3246_s2  ;;  %v2683_v30 = vmul.f32 %v3683_v61, %v3683_v61 }
0x115d   :  { %2130 = vperm.xlu1 %3182, %v3683_v61   ;;  %2086 = vperm.xlu0 %3181, %v3683_v61  }
0x11cb   :  { %v2095_v62 = vpop.permute.xlu1 %2094  ;;  %v2051_v17 = vpop.permute.xlu0 %2050 }
0x11cc   :  { %2097 = vxpose.xlu1.b32.start.end [1/1] (short) (narrow) %v2095_v62, 8  ;;  %2053 = vxpose.xlu0.b32.start.end [1/1] (short) (narrow) %v2051_v17, 8 }
0x11d8   :  { %v2131_v53 = vpop.permute.xlu1 %2130  ;;  %v2087_v15 = vpop.permute.xlu0 %2086 }
0x11ea   :  { %2359 = vrot.lane.b32.xlu1 %v3681_v36, %s3246_s2 }
0x11eb   :  { %3183 = vset.pattern.permute.xlu1 %v3245_v12 }
0x11ee   :  { %2403 = vrot.lane.b32.xlu1 %v3681_v36, %s3248_s21 }
0x11f2   :  { %2395 = vperm.xlu1 %3183, %v3681_v36  }
0x11f5   :  { %3184 = vset.pattern.permute.xlu0 %v3247_v18 }
0x1248   :  { %v2113_v63 = vpop.trf.xlu1  ;;  %v2069_v0 = vpop.trf.xlu0 }
0x1249   :  { %v2136_v2 = vrot.slane %v2113_v63, %v3358_v24  ;;  %v2092_v3 = vrot.slane %v2069_v0, %v3358_v24 }
0x124b   :  { %v2137_v4 = vsub.f32 %v2131_v53, %v2136_v2  ;;  %v3700_v5 = vsub.f32 %v2087_v15, %v2092_v3 }
0x124d   :  { %v2139_v7 = vmul.f32 %v2137_v4, %v2137_v4  ;;  %v2138_v12 = vmul.f32 %v3700_v5, %v3700_v5 }
0x124f   :  { %v3704_v8 = vadd.f32 %v2139_v7, %v2138_v12 }
0x1251   :  { %v2148_v18 = vsel %vm397_vm3, %v3704_v8, 0.0  ;;  %vm2141_vm7 = vcmp.gt.f32.partialorder %v3704_v8, 0.0 }
0x1252   :  { %2149 = vadd.xlane.f32.xlu0 %v2148_v18  ;;  %v2142_v62 = vsel %vm2141_vm7, %v3704_v8, 1.0 }
0x125c   :  { %v2360_v9 = vpop.permute.xlu1 %2359 }
0x125d   :  { %2362 = vxpose.xlu1.b32.start.end [1/1] (short) (narrow) %v2360_v9, 8 }
0x1260   :  { %v2404_v14 = vpop.permute.xlu1 %2403 }
0x1261   :  { %2406 = vxpose.xlu1.b32.start.end [1/1] (short) (narrow) %v2404_v14, 8 }
0x126d   :  { %v2396_v16 = vpop.permute.xlu1 %2395 }
0x127f   :  { %1973 = vrot.lane.b32.xlu1 %v3683_v61, %s3251_s22 }
0x12d9   :  { %v2378_v19 = vpop.trf.xlu1 }
0x12da   :  { %v2401_v60 = vrot.slane %v2378_v19, %v3358_v24 }
0x12db   :  { %v2150_v20 = vpop.xlane.xlu0 %2149 }
0x12dc   :  { %v3711_v23 = vsub.f32 %v2396_v16, %v2401_v60  ;;  %v2151_v25 = vrot.slane %v2150_v20, 4 }
0x12dd   :  { %v2422_v31 = vpop.trf.xlu1 }
0x12de   :  { %v2152_v27 = vadd.f32 %v2151_v25, %v2150_v20  ;;  %v2445_v42 = vrot.slane %v2422_v31, %v3358_v24  ;;  %v2447_v47 = vmul.f32 %v3711_v23, %v3711_v23 }
0x12e0   :  { %v2153_v41 = vrot.slane %v2152_v27, 2 }
0x12e2   :  { %v2154_v10 = vadd.f32 %v2153_v41, %v2152_v27 }
0x12e4   :  { %v2155_v6 = vrot.slane %v2154_v10, 1 }
0x12e6   :  { %v2156_v28 = vadd.f32 %v2155_v6, %v2154_v10 }
0x12e8   :  { %3155 = vpush %v2156_v28 }
0x12f1   :  { %v1974_v29 = vpop.permute.xlu1 %1973 }
0x12f2   :  { %3090 = vmatpush3.xpose.msk.msra.mxu1 %vm139_vm2, %v1974_v29 }
0x12f3   :  { %3099 = vmatprep.subr.mxu1 %v3249_v38 }
0x12f5   :  { %3092 = vmatmul.mubr.msk.f32.vlgmr.msra.gmra.mxu1 %vm139_vm2, %v3683_v61 }
0x12f6   :  { %3101 = vmatprep.mubr.msk.f32.mxu1 %vm3250_vm4, %v3249_v38 }
0x1319   :  { %s3719_s3 = spop %3155 }
0x131a   :  { %s2160_s2 = smul.f32 0.015625, %s3719_s3 }
0x131c   :  { %v2161_v22 = vstv %s2160_s2 }
0x131d   :  { %v2162_v33 = vsub.f32 %v3704_v8, %v2161_v22 }
0x131f   :  { %v2163_v21 = vmul.f32 %v2162_v33, %v2162_v33 }
0x1321   :  { %v2164_v35 = vsel %vm397_vm3, %v2163_v21, 0.0 }
0x1322   :  { %2165 = vadd.xlane.f32.xlu0 %v2164_v35 }
0x1338   :  { %2439 = vperm.xlu0 %3184, %v3681_v36  }
0x13ab   :  { %v2166_v11 = vpop.xlane.xlu0 %2165 }
0x13ac   :  { %v2167_v39 = vrot.slane %v2166_v11, 4 }
0x13ae   :  { %v2168_v40 = vadd.f32 %v2167_v39, %v2166_v11 }
0x13b0   :  { %v2169_v34 = vrot.slane %v2168_v40, 2 }
0x13b2   :  { %v2170_v26 = vadd.f32 %v2169_v34, %v2168_v40 }
0x13b3   :  { %v2440_v43 = vpop.permute.xlu0 %2439 }
0x13b4   :  { %v2446_v44 = vsub.f32 %v2440_v43, %v2445_v42  ;;  %v2171_v45 = vrot.slane %v2170_v26, 1 }
0x13b5   :  { %v2045_v46 = vpop.f32.mrf.mxu1 }
0x13b6   :  { %v2448_v32 = vmul.f32 %v2446_v44, %v2446_v44  ;;  %v2172_v48 = vadd.f32 %v2171_v45, %v2170_v26  ;;  %v2049_v3 = vmul.f32 0.17677669, %v2045_v46 }
0x13b7   :  { %v3093_v49 = vpop.f32.mrf.mxu1 }
0x13b8   :  { %v3730_v51 = vadd.f32 %v2448_v32, %v2447_v47  ;;  %3157 = vpush %v2172_v48 }
0x13ba   :  { %v2457_v52 = vsel %vm397_vm3, %v3730_v51, 0.0  ;;  %vm2450_vm14 = vcmp.gt.f32.partialorder %v3730_v51, 0.0 }
0x13bb   :  { %2458 = vadd.xlane.f32.xlu0 %v2457_v52  ;;  %v2451_v43 = vsel %vm2450_vm14, %v3730_v51, 1.0 }
0x13d1   :  { %2282 = vrot.lane.b32.xlu0 %v3681_v36, %s3251_s22 }
0x13e9   :  { %s3158_s21 = spop %3157 }
0x13ea   :  { %s2176_s17 = smul.f32 0.015873017, %s3158_s21 }
0x13ec   :  { %v2177_v54 = vstv %s2176_s17 }
0x13ed   :  { %3225 = vrsqrt.f32 %v2177_v54  ;;  %vm2180_vm5 = vcmp.eq.f32.partialorder %v2177_v54, inf  ;;  %v2183_v37 = vand.u32 2147483648, %v2177_v54  ;;  %vm2182_vm6 = vcmp.eq.f32.partialorder %v2177_v54, 0.0 }
0x13ee   :  { %3227 = vrsqrt.f32 %v2142_v62 }
0x13fa   :  { %v3226_v55 = vpop.eup %3225 }
0x13fb   :  { %v2179_v56 = vmul.f32 %v3226_v55, %v2177_v54  ;;  %v3228_v17 = vpop.eup %3227 }
0x13fc   :  { %v2144_v53 = vmul.f32 %v3228_v17, %v3700_v5 }
0x13fd   :  { %v2181_v50 = vsel %vm2180_vm5, %v2177_v54, %v2179_v56 }
0x13fe   :  { %v2184_v59 = vsel %vm2182_vm6, %v2183_v37, %v2181_v50  ;;  %v2145_v15 = vsel %vm2141_vm7, %v2144_v53, 1.0 }
0x13ff   :  { %3159 = vpush %v2184_v59  ;;  %v2146_v63 = vadd.f32 1.0, %v2145_v15 }
0x1401   :  { %v2147_v2 = vmul.f32 0.5, %v2146_v63  ;;  %v2684_v63 = vmul.f32 %v3681_v36, %v3681_v36 }
0x1430   :  { %s3160_s22 = spop %3159 }
0x1431   :  { %s2186_s18 = smul.f32 1.25, %s3160_s22 }
0x1433   :  { %s2187_s19 = sadd.f32 %s2186_s18, %s2160_s2 }
0x1435   :  { %v2188_v0 = vstv %s2187_s19 }
0x1436   :  { %vm2189_vm9 = vcmp.le.f32.partialorder %v3704_v8, %v2188_v0 }
0x1437   :  { %vm2190_vm10 = vmand %vm2189_vm9, %vm3411_vm8 }
0x1438   :  { %v2191_v4 = vsel %vm2190_vm10, %v2147_v2, 0.0 }
0x1439   :  { %vm2192_vm11 = vcmp.eq.f32.partialorder %v2191_v4, 0.0 }
0x143a   :  { %v2193_v7 = vsel %vm2192_vm11, -1e+30, %v2049_v3 }
0x143b   :  { %v2194_v12 = vsel %vm397_vm3, %v2193_v7, -inf }
0x143c   :  { %2195 = vmax.xlane.f32.xlu0 %v2194_v12 }
0x1444   :  { %v2459_v5 = vpop.xlane.xlu0 %2458 }
0x1445   :  { %v2460_v18 = vrot.slane %v2459_v5, 4 }
0x1447   :  { %v2461_v9 = vadd.f32 %v2460_v18, %v2459_v5 }
0x1448   :  { %v2283_v14 = vpop.permute.xlu0 %2282 }
0x1449   :  { %v2462_v16 = vrot.slane %v2461_v9, 2  ;;  %3100 = vmatpush3.xpose.msk.msra.mxu1 %vm139_vm2, %v2283_v14 }
0x144b   :  { %v2463_v19 = vadd.f32 %v2462_v16, %v2461_v9 }
0x144c   :  { %3102 = vmatmul.mubr.msk.f32.vlgmr.msra.gmra.mxu1 %vm139_vm2, %v3681_v36 }
0x144d   :  { %v2464_v8 = vrot.slane %v2463_v19, 1 }
0x144f   :  { %v2465_v60 = vadd.f32 %v2464_v8, %v2463_v19 }
0x1451   :  { %3161 = vpush %v2465_v60 }
0x1452   :  { %2514 = vrot.lane.b32.xlu0 %v3681_v36, %s3252_s30 }
0x1482   :  { %s3750_s20 = spop %3161 }
0x1483   :  { %s2469_s23 = smul.f32 0.015625, %s3750_s20 }
0x1485   :  { %v2470_v20 = vstv %s2469_s23 }
0x1486   :  { %v2471_v25 = vsub.f32 %v3730_v51, %v2470_v20 }
0x1488   :  { %v2472_v27 = vmul.f32 %v2471_v25, %v2471_v25 }
0x148a   :  { %v2473_v41 = vsel %vm397_vm3, %v2472_v27, 0.0 }
0x148b   :  { %2474 = vadd.xlane.f32.xlu1 %v2473_v41  ;;  %v2911_v41 = vld [vmem:[%s3839_s4 + $0x68] sm:$0xff] }
0x148c   :  { %3109 = vmatprep.subr.mxu1 %v2911_v41 }
0x148d   :  { %3110 = vmatpush3.msra.mxu1 %v2911_v41 }
0x14c5   :  { %v2196_v44 = vpop.xlane.xlu0 %2195 }
0x14c6   :  { %v2197_v45 = vsub.f32 %v2193_v7, %v2196_v44 }
0x14c8   :  { %v2198_v47 = vmul.f32 1.442695, %v2197_v45 }
0x14c9   :  { %v2515_v12 = vpop.permute.xlu0 %2514 }
0x150c   :  { %v2354_v10 = vpop.f32.mrf.mxu1 }
0x150d   :  { %v2358_v55 = vmul.f32 0.17677669, %v2354_v10  ;;  %v2910_v10 = vld [vmem:[%s3839_s4 + $0x60] sm:$0xff] }
0x150e   :  { %v3103_v6 = vpop.f32.mrf.mxu1  ;;  %3111 = vmatprep.subr.mxu1 %v2910_v10 }
0x150f   :  { %v2909_v6 = vld [vmem:[%s3839_s4 + $0x58] sm:$0xff]  ;;  %3112 = vmatpush3.msra.mxu1 %v2910_v10 }
0x1510   :  { %3113 = vmatprep.subr.mxu1 %v2909_v6 }
0x1511   :  { %3114 = vmatpush3.msra.mxu1 %v2909_v6 }
0x1514   :  { %v2475_v28 = vpop.xlane.xlu1 %2474 }
0x1515   :  { %v2476_v31 = vrot.slane %v2475_v28, 4 }
0x1517   :  { %v2477_v29 = vadd.f32 %v2476_v31, %v2475_v28  ;;  %v2908_v28 = vld [vmem:[%s3839_s4 + $0x50] sm:$0xff] }
0x1518   :  { %3115 = vmatprep.subr.mxu1 %v2908_v28 }
0x1519   :  { %v2478_v22 = vrot.slane %v2477_v29, 2  ;;  %3116 = vmatpush3.msra.mxu1 %v2908_v28 }
0x151b   :  { %v2479_v33 = vadd.f32 %v2478_v22, %v2477_v29 }
0x151d   :  { %v2480_v21 = vrot.slane %v2479_v33, 1 }
0x151f   :  { %v2481_v35 = vadd.f32 %v2480_v21, %v2479_v33 }
0x1521   :  { %3163 = vpush %v2481_v35 }
0x1552   :  { %s3164_s24 = spop %3163 }
0x1553   :  { %s2485_s25 = smul.f32 0.015873017, %s3164_s24 }
0x1555   :  { %v2486_v11 = vstv %s2485_s25 }
0x1556   :  { %3229 = vrsqrt.f32 %v2486_v11  ;;  %vm2489_vm12 = vcmp.eq.f32.partialorder %v2486_v11, inf  ;;  %v2492_v42 = vand.u32 2147483648, %v2486_v11  ;;  %vm2491_vm13 = vcmp.eq.f32.partialorder %v2486_v11, 0.0 }
0x1557   :  { %3231 = vrsqrt.f32 %v2451_v43  ;;  %v2916_v43 = vld [vmem:[%s3840_s5 + $0x8] sm:$0x7] }
0x1558   :  { %3233 = vpow2.f32 %v2198_v47  ;;  %v2740_v44 = vrot.slane %v2916_v43, %v3492_v1  ;;  %v2724_v45 = vrot.slane %v2916_v43, %v3358_v24 }
0x1563   :  { %v3230_v39 = vpop.eup %3229 }
0x1564   :  { %v2488_v40 = vmul.f32 %v3230_v39, %v2486_v11  ;;  %v3232_v46 = vpop.eup %3231 }
0x1565   :  { %v2453_v32 = vmul.f32 %v3232_v46, %v3711_v23  ;;  %v3234_v50 = vpop.eup %3233 }
0x1566   :  { %v2490_v34 = vsel %vm2489_vm12, %v2486_v11, %v2488_v40  ;;  %v2200_v59 = vsel %vm397_vm3, %v3234_v50, 0.0  ;;  %v2760_v40 = vld [vmem:[%s3841_s6 + $0x18] sm:$0xff] }
0x1567   :  { %v2493_v26 = vsel %vm2491_vm13, %v2492_v42, %v2490_v34  ;;  %v2454_v48 = vsel %vm2450_vm14, %v2453_v32, 1.0  ;;  %v2757_v42 = vld [vmem:[%s3841_s6] sm:$0xff] }
0x1568   :  { %3165 = vpush %v2493_v26  ;;  %v2455_v49 = vadd.f32 1.0, %v2454_v48 }
0x156a   :  { %v2456_v54 = vmul.f32 0.5, %v2455_v49 }
0x1599   :  { %s3166_s26 = spop %3165 }
0x159a   :  { %s2495_s27 = smul.f32 1.25, %s3166_s26 }
0x159c   :  { %s2496_s28 = sadd.f32 %s2495_s27, %s2469_s23 }
0x159e   :  { %v2497_v52 = vstv %s2496_s28 }
0x159f   :  { %vm2498_vm15 = vcmp.le.f32.partialorder %v3730_v51, %v2497_v52 }
0x15a0   :  { %vm2499_vm0 = vmand %vm2498_vm15, %vm3411_vm8 }
0x15a1   :  { %v2500_v56 = vsel %vm2499_vm0, %v2456_v54, 0.0  ;;  %v2748_v54 = vrot.slane %v2916_v43, %v3500_v13 }
0x15a2   :  { %vm2501_vm1 = vcmp.eq.f32.partialorder %v2500_v56, 0.0 }
0x15a3   :  { %v2502_v37 = vsel %vm2501_vm1, -1e+30, %v2358_v55 }
0x15a4   :  { %v2503_v23 = vsel %vm397_vm3, %v2502_v37, -inf }
0x15a5   :  { %2504 = vmax.xlane.f32.xlu1 %v2503_v23 }
0x15a9   :  { %2201 = vadd.xlane.f32.xlu1 %v2200_v59 }
0x162e   :  { %v2505_v62 = vpop.xlane.xlu1 %2504 }
0x162f   :  { %v2506_v17 = vsub.f32 %v2502_v37, %v2505_v62  ;;  %v2913_v37 = vld [vmem:[%s3839_s4 + $0x70] ss:$0 sm:$0xff] }
0x1631   :  { %v2507_v53 = vmul.f32 1.442695, %v2506_v17 }
0x1632   :  { %v2202_v0 = vpop.xlane.xlu1 %2201 }
0x1633   :  { %3235 = vpow2.f32 %v2507_v53 }
0x1634   :  { %3237 = vrcp.f32 %v2202_v0 }
0x1640   :  { %v3236_v51 = vpop.eup %3235 }
0x1641   :  { %v2509_v15 = vsel %vm397_vm3, %v3236_v51, 0.0  ;;  %v3238_v3 = vpop.eup %3237 }
0x1642   :  { %2510 = vadd.xlane.f32.xlu1 %v2509_v15  ;;  %v2204_v7 = vmul.f32 %v3238_v3, %v3234_v50 }
0x1653   :  { %2205 = vrot.lane.b32.xlu1 %v3683_v61, %s3252_s30 }
0x1657   :  { %2687 = vrot.lane.b32.xlu1 %v2683_v30, %s3253_s15 }
0x165b   :  { %2689 = vrot.lane.b32.xlu1 %v2684_v63, %s3253_s15 }
0x16cb   :  { %v2511_v2 = vpop.xlane.xlu1 %2510 }
0x16cc   :  { %3239 = vrcp.f32 %v2511_v2 }
0x16cf   :  { %v2206_v4 = vpop.permute.xlu1 %2205 }
0x16d0   :  { %3095 = vmatpush3.msra.mxu0 %v2206_v4 }
0x16d1   :  { %3097 = vmatmul.mubr.msk.f32.vlgmr.msra.gmra.mxu0 %vm397_vm3, %v2204_v7  ;;  %3104 = vmatprep.subr.mxu0 %v3249_v38 }
0x16d2   :  { %3105 = vmatpush3.msra.mxu0 %v2515_v12  ;;  %3106 = vmatprep.mubr.msk.f32.mxu0 %vm3250_vm4, %v3249_v38 }
0x16d3   :  { %v2688_v5 = vpop.permute.xlu1 %2687  ;;  %3120 = vmatprep.subr.mxu0 %v2760_v40 }
0x16d4   :  { %v2693_v18 = vadd.f32 %v2688_v5, %v2683_v30 }
0x16d6   :  { %v2695_v9 = vmax.f32 %v2693_v18, 1e-24 }
0x16d7   :  { %v2690_v14 = vpop.permute.xlu1 %2689 }
0x16d8   :  { %3241 = vrsqrt.f32 %v2695_v9  ;;  %v2694_v16 = vadd.f32 %v2690_v14, %v2684_v63  ;;  %v2917_v63 = vld [vmem:[%s3842_s7] ss:$0 sm:$0xff] }
0x16d9   :  { %v3240_v19 = vpop.eup %3239 }
0x16da   :  { %v2696_v8 = vmax.f32 %v2694_v16, 1e-24  ;;  %v2513_v60 = vmul.f32 %v3240_v19, %v3236_v51 }
0x16dc   :  { %3243 = vrsqrt.f32 %v2696_v8  ;;  %3107 = vmatmul.mubr.msk.f32.vlgmr.msra.gmra.mxu0 %vm397_vm3, %v2513_v60 }
0x16dd   :  { %3121 = vmatpush3.msra.mxu0 %v2760_v40 }
0x16e5   :  { %v3242_v20 = vpop.eup %3241 }
0x16e6   :  { %2703 = vrot.lane.b32.xlu1 %v3242_v20, %s3254_s0  ;;  %v2699_v25 = vmul.f32 %v3242_v20, %v3683_v61 }
0x16e9   :  { %v3244_v27 = vpop.eup %3243 }
0x16ea   :  { %2713 = vperm.xlu1 %3183, %v2699_v25   ;;  %2705 = vrot.lane.b32.xlu0 %v3244_v27, %s3254_s0  ;;  %v2700_v38 = vmul.f32 %v3244_v27, %v3681_v36 }
0x16ee   :  { %2718 = vperm.xlu1 %3183, %v2700_v38  }
0x1758   :  { %v2704_v31 = vpop.permute.xlu1 %2703 }
0x1759   :  { %v2709_v29 = vmul.f32 %v2704_v31, %v3683_v61  ;;  %v2759_v61 = vld [vmem:[%s3841_s6 + $0x10] sm:$0xff] }
0x175a   :  { %3122 = vmatprep.subr.mxu0 %v2759_v61 }
0x175b   :  { %2729 = vperm.xlu0 %3184, %v2709_v29   ;;  %3123 = vmatpush3.msra.mxu0 %v2759_v61 }
0x175c   :  { %v2706_v22 = vpop.permute.xlu0 %2705 }
0x175d   :  { %v2710_v33 = vmul.f32 %v2706_v22, %v3681_v36  ;;  %v2758_v36 = vld [vmem:[%s3841_s6 + $0x8] sm:$0xff] }
0x175e   :  { %3124 = vmatprep.subr.mxu0 %v2758_v36 }
0x175f   :  { %2734 = vperm.xlu0 %3184, %v2710_v33   ;;  %3125 = vmatpush3.msra.mxu0 %v2758_v36 }
0x1760   :  { %3126 = vmatprep.subr.mxu0 %v2757_v42 }
0x1761   :  { %3127 = vmatpush3.msra.mxu0 %v2757_v42 }
0x1765   :  { %v2714_v26 = vpop.permute.xlu1 %2713 }
0x1766   :  { %v2725_v49 = vmul.f32 %v2724_v45, %v2714_v26 }
0x1769   :  { %v2719_v47 = vpop.permute.xlu1 %2718 }
0x176a   :  { %v2726_v52 = vmul.f32 %v2724_v45, %v2719_v47 }
0x1791   :  { %v2277_v21 = vpop.f32.mrf.mxu0 }
0x1792   :  { %3117 = vmatprep.mubr.msk.f32.mxu1 %vm139_vm2, %v2277_v21 }
0x1793   :  { %v3098_v35 = vpop.f32.mrf.mxu0 }
0x179c   :  { %v2586_v11 = vpop.f32.mrf.mxu0 }
0x179d   :  { %3118 = vmatmul.mubr.msk.f32.vlgmr.msra.gmra.mxu1 %vm139_vm2, %v2586_v11 }
0x179e   :  { %v3108_v39 = vpop.f32.mrf.mxu0 }
0x17d6   :  { %v2730_v34 = vpop.permute.xlu0 %2729 }
0x17d7   :  { %v2741_v32 = vmul.f32 %v2740_v44, %v2730_v34 }
0x17d9   :  { %v2743_v55 = vadd.f32 %v2741_v32, %v2725_v49 }
0x17da   :  { %v2735_v46 = vpop.permute.xlu0 %2734 }
0x17db   :  { %v2742_v48 = vmul.f32 %v2740_v44, %v2735_v46  ;;  %v2749_v50 = vadd.f32 %v2748_v54, %v2743_v55 }
0x17dd   :  { %v2744_v56 = vadd.f32 %v2742_v48, %v2726_v52  ;;  %v2753_v53 = vmul.f32 0.1, %v2749_v50 }
0x17df   :  { %v2750_v1 = vadd.f32 %v2748_v54, %v2744_v56 }
0x17e1   :  { %v2754_v15 = vmul.f32 0.1, %v2750_v1 }
0x185d   :  { %v3119_v23 = vpop.f32.mrf.mxu1 }
0x185e   :  { %v2678_v59 = vadd.f32 %v3119_v23, %v2913_v37 }
0x185f   :  { %v2672_v62 = vpop.f32.mrf.mxu1 }
0x1860   :  { %v2673_v24 = vadd.f32 %v2913_v37, %v2672_v62  ;;  %v2752_v17 = vadd.f32 %v2678_v59, %v3670_v58 }
0x1862   :  { %v2751_v51 = vadd.f32 %v2673_v24, %v3668_v57  ;;  %v2756_v13 = vadd.f32 %v2754_v15, %v2752_v17 }
0x1864   :  { %v2755_v30 = vadd.f32 %v2753_v53, %v2751_v51 }
0x1866   :  { %3128 = vmatprep.mubr.msk.f32.mxu0 %vm139_vm2, %v2755_v30 }
0x1867   :  { %3129 = vmatmul.mubr.msk.f32.vlgmr.msra.gmra.mxu0 %vm139_vm2, %v2756_v13 }
0x1927   :  { %v3130_v0 = vpop.f32.mrf.mxu0 }
0x1928   :  { %v2846_v2 = vadd.f32 %v3130_v0, %v2917_v63 }
0x1929   :  { %v2840_v3 = vpop.f32.mrf.mxu0 }
0x192a   :  { %2850 = vst [vmem:[%s3843_s8 + $0x8] sm:$0xff] %v2846_v2  ;;  %v2841_v58 = vadd.f32 %v2917_v63, %v2840_v3 }
0x192c   :  { %2849 = vst [vmem:[%s3843_s8] sm:$0xff] %v2841_v58 }

</bundles_post_ra>
